<compile_context>
chip_gen: v7x
topology: tpu7x:2x2x1
jax: 0.10.0
libtpu: 0.0.40
codegen_flags: <defaults>
</compile_context>

<pallas_src>
import jax
import jax.numpy as jnp
from jax.experimental import pallas as pl
from jax.experimental.pallas import tpu as pltpu

EPS = 1e-5                     # nn.BatchNorm2d default eps
LANE = 128
HW_TILE_CAP = 4096             # max lanes per block (96*4096*4 = 1.5 MiB per slab)
BLOCK_BYTES_TARGET = 2 << 20   # aim for ~2 MiB activation blocks
STASH_BUDGET = 26 << 20        # total VMEM need allowed for the y-stash path (v7x-safe)


def _ceil_to(x, m):
    return -(-x // m) * m


def _hw_tiling(HW):
    """Return (HWp, t_hw): padded spatial length and lane tile; t_hw | HWp, t_hw % 128 == 0."""
    hw128 = _ceil_to(HW, LANE)
    if hw128 <= HW_TILE_CAP:
        return hw128, hw128
    for k in range(HW_TILE_CAP // LANE, 0, -1):
        t = k * LANE
        if hw128 % t == 0 and t >= 1024:
            return hw128, t
    hwp = _ceil_to(HW, 2048)          # poor divisor structure: pad a little more
    return hwp, 2048


def _pick_tn(N, slab_bytes):
    """Largest divisor of N whose block stays near the target block size."""
    cap = max(1, BLOCK_BYTES_TARGET // max(slab_bytes, 1))
    for cand in range(min(N, cap), 0, -1):
        if N % cand == 0:
            return cand
    return 1


def _make_layer1_kernel(m_true, tn, stash):
    inv_m = 1.0 / float(m_true)

    def kernel(x_ref, w_ref, gamma_ref, beta_ref, o_ref,
               sum_ref, ssq_ref, scale_ref, bias_ref, *maybe_ybuf):
        y_buf = maybe_ybuf[0] if stash else None
        p = pl.program_id(0)
        n = pl.program_id(1)
        t = pl.program_id(2)
        first_tile = jnp.logical_and(n == 0, t == 0)

        @pl.when(jnp.logical_and(p == 0, first_tile))
        def _():
            sum_ref[...] = jnp.zeros_like(sum_ref)
            ssq_ref[...] = jnp.zeros_like(ssq_ref)

        @pl.when(p == 0)
        def _():
            w = w_ref[...]
            for bi in range(tn):                              # static unroll over samples in block
                y = jnp.dot(w, x_ref[bi], preferred_element_type=jnp.float32)
                y = jnp.maximum(y, 0.0)                       # ReLU
                sum_ref[...] += jnp.sum(y, axis=1, keepdims=True)
                ssq_ref[...] += jnp.sum(y * y, axis=1, keepdims=True)
                if stash:
                    y_buf[n * tn + bi] = y

        @pl.when(jnp.logical_and(p == 1, first_tile))
        def _():
            mean = sum_ref[...] * inv_m
            var = jnp.maximum(ssq_ref[...] * inv_m - mean * mean, 0.0)
            s = gamma_ref[...] * jax.lax.rsqrt(var + EPS)
            scale_ref[...] = s
            bias_ref[...] = beta_ref[...] - mean * s

        @pl.when(p == 1)
        def _():
            scale = scale_ref[...]
            bias = bias_ref[...]
            if stash:                                         # y already in VMEM: no x re-read
                for bi in range(tn):
                    y = y_buf[n * tn + bi]
                    o_ref[bi] = (y * scale + bias).astype(o_ref.dtype)
            else:                                             # recompute path for large activations
                w = w_ref[...]
                for bi in range(tn):
                    y = jnp.dot(w, x_ref[bi], preferred_element_type=jnp.float32)
                    y = jnp.maximum(y, 0.0)
                    o_ref[bi] = (y * scale + bias).astype(o_ref.dtype)

    return kernel


def layer1_forward(x_nchw, conv_w, gamma, beta):
    """x_nchw: (N, 96, H, W) f32; conv_w: (96, 96, 1, 1); gamma/beta: (96,).
    Returns (N, 96, H, W) matching the PyTorch training-mode forward."""
    N, C, H, W = x_nchw.shape
    Cout, Cin, kh, kw = conv_w.shape
    assert C == Cin == Cout and kh == 1 and kw == 1

    HW = H * W
    M = N * HW
    HWp, t_hw = _hw_tiling(HW)

    # (N, C, H, W) -> (N, C, HW) is a free reshape; pad HW only when not lane-aligned.
    x3 = x_nchw.reshape(N, C, HW)
    if HWp != HW:
        # zero columns: ReLU(W @ 0) = 0, and mean divides by the true M -> stats stay exact
        x3 = jnp.pad(x3, ((0, 0), (0, 0), (0, HWp - HW)))

    tn = _pick_tn(N, C * t_hw * 4) if t_hw == HWp else 1
    n_tiles, hw_tiles = N // tn, HWp // t_hw

    w2 = conv_w.reshape(Cout, Cin).astype(jnp.float32)        # (out, in)
    g2 = gamma.reshape(C, 1).astype(jnp.float32)
    b2 = beta.reshape(C, 1).astype(jnp.float32)

    # VMEM accounting (v7x: 64 MiB physical / 32 MiB scoped default is the binding constraint).
    blk_bytes = tn * C * t_hw * 4
    pipe_bytes = 4 * blk_bytes + 2 * C * C * 4 + (1 << 20)    # dbl-buffered x & out + weights + slack
    ybuf_bytes = N * C * HWp * 4
    stash = (t_hw == HWp) and (pipe_bytes + ybuf_bytes <= STASH_BUDGET)
    vmem_limit = int(max(pipe_bytes + (ybuf_bytes if stash else 0) + (4 << 20), 32 << 20))

    scratch = [pltpu.VMEM((C, 1), jnp.float32) for _ in range(4)]   # sum, sumsq, scale, bias
    if stash:
        scratch.append(pltpu.VMEM((N, C, HWp), jnp.float32))        # persistent y stash

    if stash:
        x_map = lambda p, n, t: ((1 - p) * n, 0, (1 - p) * t)       # phase 1 never re-reads x
    else:
        x_map = lambda p, n, t: (n, 0, t)
    # phase 0 parks the (unwritten) output window on block 0; phase 1 writes every block.
    o_map = lambda p, n, t: (p * n, 0, p * t)

    out_pad = pl.pallas_call(
        _make_layer1_kernel(M, tn, stash),
        out_shape=jax.ShapeDtypeStruct((N, C, HWp), x_nchw.dtype),
        grid=(2, n_tiles, hw_tiles),
        in_specs=[
            pl.BlockSpec((tn, C, t_hw), x_map),
            pl.BlockSpec((C, C), lambda p, n, t: (0, 0)),
            pl.BlockSpec((C, 1), lambda p, n, t: (0, 0)),
            pl.BlockSpec((C, 1), lambda p, n, t: (0, 0)),
        ],
        out_specs=pl.BlockSpec((tn, C, t_hw), o_map),
        scratch_shapes=scratch,
        compiler_params=pltpu.CompilerParams(
            dimension_semantics=("arbitrary", "arbitrary", "arbitrary"),
            vmem_limit_bytes=vmem_limit),
    )(x3, w2, g2, b2)

    out3 = out_pad[:, :, :HW] if HWp != HW else out_pad
    return out3.reshape(N, C, H, W)


def layer1_reference(x_nchw, conv_w, gamma, beta):
    """Pure-JAX reference matching PyTorch semantics (training-mode BN, biased batch var)."""
    y = jax.lax.conv_general_dilated(
        x_nchw, conv_w, window_strides=(1, 1), padding="VALID",
        dimension_numbers=("NCHW", "OIHW", "NCHW"))
    y = jnp.maximum(y, 0.0)
    mean = jnp.mean(y, axis=(0, 2, 3), keepdims=True)
    var = jnp.mean((y - mean) ** 2, axis=(0, 2, 3), keepdims=True)
    g = gamma.reshape(1, -1, 1, 1)
    b = beta.reshape(1, -1, 1, 1)
    return (y - mean) / jnp.sqrt(var + EPS) * g + b


if __name__ == "__main__":
    key = jax.random.PRNGKey(0)
    kx, kw, kg, kb = jax.random.split(key, 4)

    N, C, H, W = 2, 96, 16, 16   # channel count fixed at 96 by the module; small spatial/batch
    x = jax.random.normal(kx, (N, C, H, W), dtype=jnp.float32)
    conv_w = 0.1 * jax.random.normal(kw, (96, 96, 1, 1), dtype=jnp.float32)
    gamma = 1.0 + 0.1 * jax.random.normal(kg, (96,), dtype=jnp.float32)
    beta = 0.1 * jax.random.normal(kb, (96,), dtype=jnp.float32)

    out = layer1_forward(x, conv_w, gamma, beta)
    jax.block_until_ready(out)

    ref = layer1_reference(x, conv_w, gamma, beta)
    assert out.shape == (N, C, H, W)
    assert jnp.allclose(out, ref, atol=1e-4, rtol=1e-4), "mismatch vs reference"

    print("KERNEL_OK")
</pallas_src>

<mosaic_0001>
module attributes {stable_mosaic.version = 11 : i64} {
  func.func @kernel(%arg0: i32, %arg1: i32, %arg2: i32, %arg3: memref<2x96x256xf32, #tpu.memory_space<vmem>>, %arg4: memref<96x96xf32, #tpu.memory_space<vmem>>, %arg5: memref<96x1xf32, #tpu.memory_space<vmem>>, %arg6: memref<96x1xf32, #tpu.memory_space<vmem>>, %arg7: memref<2x96x256xf32, #tpu.memory_space<vmem>>, %arg8: memref<96x1xf32, #tpu.memory_space<vmem>>, %arg9: memref<96x1xf32, #tpu.memory_space<vmem>>, %arg10: memref<96x1xf32, #tpu.memory_space<vmem>>, %arg11: memref<96x1xf32, #tpu.memory_space<vmem>>, %arg12: memref<2x96x256xf32, #tpu.memory_space<vmem>>) attributes {dimension_semantics = [#tpu.dimension_semantics<arbitrary>, #tpu.dimension_semantics<arbitrary>, #tpu.dimension_semantics<arbitrary>], iteration_bounds = array<i64: 2, 1, 1>, scalar_prefetch = 0 : i64, scratch_operands = 5 : i64, tpu.core_type = #tpu.core_type<tc>, window_params = [{transform_indices = @transform_0, window_bounds = array<i64: 2, 96, 256>}, {pipeline_mode = #tpu.pipeline_mode<synchronous>, transform_indices = @transform_1, window_bounds = array<i64: 96, 96>}, {pipeline_mode = #tpu.pipeline_mode<synchronous>, transform_indices = @transform_2, window_bounds = array<i64: 96, 1>}, {pipeline_mode = #tpu.pipeline_mode<synchronous>, transform_indices = @transform_3, window_bounds = array<i64: 96, 1>}, {transform_indices = @transform_4, window_bounds = array<i64: 2, 96, 256>}]} {
    %c0_i32 = arith.constant 0 : i32
    %0 = arith.cmpi eq, %arg1, %c0_i32 : i32
    %c0_i32_0 = arith.constant 0 : i32
    %1 = arith.cmpi eq, %arg2, %c0_i32_0 : i32
    %2 = arith.andi %0, %1 : i1
    %c0_i32_1 = arith.constant 0 : i32
    %3 = arith.cmpi eq, %arg0, %c0_i32_1 : i32
    %4 = arith.andi %3, %2 : i1
    %5 = arith.extui %4 : i1 to i32
    %c0_i32_2 = arith.constant 0 : i32
    %6 = arith.cmpi ne, %5, %c0_i32_2 : i32
    scf.if %6 {
      %cst = arith.constant 0.000000e+00 : f32
      %17 = vector.broadcast %cst : f32 to vector<96x1xf32>
      %c0 = arith.constant 0 : index
      %c0_8 = arith.constant 0 : index
      %18 = vector.load %arg8[%c0, %c0_8] : memref<96x1xf32, #tpu.memory_space<vmem>>, vector<96x1xf32>
      tpu.vector_store %arg8[%c0, %c0_8], %17 {strides = array<i32>} : memref<96x1xf32, #tpu.memory_space<vmem>>, vector<96x1xf32>,
      %cst_9 = arith.constant 0.000000e+00 : f32
      %19 = vector.broadcast %cst_9 : f32 to vector<96x1xf32>
      %c0_10 = arith.constant 0 : index
      %c0_11 = arith.constant 0 : index
      %20 = vector.load %arg9[%c0_10, %c0_11] : memref<96x1xf32, #tpu.memory_space<vmem>>, vector<96x1xf32>
      tpu.vector_store %arg9[%c0_10, %c0_11], %19 {strides = array<i32>} : memref<96x1xf32, #tpu.memory_space<vmem>>, vector<96x1xf32>,
    } else {
    }
    %c0_i32_3 = arith.constant 0 : i32
    %7 = arith.cmpi eq, %arg0, %c0_i32_3 : i32
    %8 = arith.extui %7 : i1 to i32
    %c0_i32_4 = arith.constant 0 : i32
    %9 = arith.cmpi ne, %8, %c0_i32_4 : i32
    scf.if %9 {
      %c0 = arith.constant 0 : index
      %c0_8 = arith.constant 0 : index
      %17 = vector.load %arg4[%c0, %c0_8] : memref<96x96xf32, #tpu.memory_space<vmem>>, vector<96x96xf32>
      %c0_9 = arith.constant 0 : index
      %c0_10 = arith.constant 0 : index
      %c0_11 = arith.constant 0 : index
      %18 = vector.load %arg3[%c0_9, %c0_10, %c0_11] : memref<2x96x256xf32, #tpu.memory_space<vmem>>, vector<1x96x256xf32>
      %19 = vector.shape_cast %18 : vector<1x96x256xf32> to vector<96x256xf32>
      %cst = arith.constant dense<0.000000e+00> : vector<96x256xf32>
      %20 = tpu.matmul %17, %19, %cst {dimension_numbers = #tpu.dot_dimension_numbers<[1], [0], [0], [1], [0, 0, 1, 1], [], []>} : vector<96x96xf32>, vector<96x256xf32>, vector<96x256xf32> -> vector<96x256xf32>
      %cst_12 = arith.constant 0.000000e+00 : f32
      %21 = vector.broadcast %cst_12 : f32 to vector<96x256xf32>
      %22 = arith.maximumf %20, %21 : vector<96x256xf32>
      %c0_13 = arith.constant 0 : index
      %c0_14 = arith.constant 0 : index
      %23 = vector.load %arg8[%c0_13, %c0_14] : memref<96x1xf32, #tpu.memory_space<vmem>>, vector<96x1xf32>
      %cst_15 = arith.constant dense<0.000000e+00> : vector<96xf32>
      %24 = vector.multi_reduction <add>, %22, %cst_15 [1] : vector<96x256xf32> to vector<96xf32>
      %25 = vector.shape_cast %24 : vector<96xf32> to vector<96x1xf32>
      %26 = arith.addf %23, %25 : vector<96x1xf32>
      %c0_16 = arith.constant 0 : index
      %c0_17 = arith.constant 0 : index
      %27 = vector.load %arg8[%c0_16, %c0_17] : memref<96x1xf32, #tpu.memory_space<vmem>>, vector<96x1xf32>
      tpu.vector_store %arg8[%c0_16, %c0_17], %26 {strides = array<i32>} : memref<96x1xf32, #tpu.memory_space<vmem>>, vector<96x1xf32>,
      %c0_18 = arith.constant 0 : index
      %c0_19 = arith.constant 0 : index
      %28 = vector.load %arg9[%c0_18, %c0_19] : memref<96x1xf32, #tpu.memory_space<vmem>>, vector<96x1xf32>
      %29 = arith.mulf %22, %22 : vector<96x256xf32>
      %cst_20 = arith.constant dense<0.000000e+00> : vector<96xf32>
      %30 = vector.multi_reduction <add>, %29, %cst_20 [1] : vector<96x256xf32> to vector<96xf32>
      %31 = vector.shape_cast %30 : vector<96xf32> to vector<96x1xf32>
      %32 = arith.addf %28, %31 : vector<96x1xf32>
      %c0_21 = arith.constant 0 : index
      %c0_22 = arith.constant 0 : index
      %33 = vector.load %arg9[%c0_21, %c0_22] : memref<96x1xf32, #tpu.memory_space<vmem>>, vector<96x1xf32>
      tpu.vector_store %arg9[%c0_21, %c0_22], %32 {strides = array<i32>} : memref<96x1xf32, #tpu.memory_space<vmem>>, vector<96x1xf32>,
      %c2_i32 = arith.constant 2 : i32
      %34 = arith.muli %arg1, %c2_i32 : i32
      %c0_i32_23 = arith.constant 0 : i32
      %35 = arith.addi %34, %c0_i32_23 : i32
      %36 = arith.index_cast %35 : i32 to index
      %c0_24 = arith.constant 0 : index
      %c0_25 = arith.constant 0 : index
      %37 = vector.load %arg12[%36, %c0_24, %c0_25] : memref<2x96x256xf32, #tpu.memory_space<vmem>>, vector<1x96x256xf32>
      %38 = vector.shape_cast %37 : vector<1x96x256xf32> to vector<96x256xf32>
      %39 = vector.shape_cast %22 : vector<96x256xf32> to vector<1x96x256xf32>
      tpu.vector_store %arg12[%36, %c0_24, %c0_25], %39 {strides = array<i32>} : memref<2x96x256xf32, #tpu.memory_space<vmem>>, vector<1x96x256xf32>,
      %c1 = arith.constant 1 : index
      %c0_26 = arith.constant 0 : index
      %c0_27 = arith.constant 0 : index
      %40 = vector.load %arg3[%c1, %c0_26, %c0_27] : memref<2x96x256xf32, #tpu.memory_space<vmem>>, vector<1x96x256xf32>
      %41 = vector.shape_cast %40 : vector<1x96x256xf32> to vector<96x256xf32>
      %cst_28 = arith.constant dense<0.000000e+00> : vector<96x256xf32>
      %42 = tpu.matmul %17, %41, %cst_28 {dimension_numbers = #tpu.dot_dimension_numbers<[1], [0], [0], [1], [0, 0, 1, 1], [], []>} : vector<96x96xf32>, vector<96x256xf32>, vector<96x256xf32> -> vector<96x256xf32>
      %cst_29 = arith.constant 0.000000e+00 : f32
      %43 = vector.broadcast %cst_29 : f32 to vector<96x256xf32>
      %44 = arith.maximumf %42, %43 : vector<96x256xf32>
      %c0_30 = arith.constant 0 : index
      %c0_31 = arith.constant 0 : index
      %45 = vector.load %arg8[%c0_30, %c0_31] : memref<96x1xf32, #tpu.memory_space<vmem>>, vector<96x1xf32>
      %cst_32 = arith.constant dense<0.000000e+00> : vector<96xf32>
      %46 = vector.multi_reduction <add>, %44, %cst_32 [1] : vector<96x256xf32> to vector<96xf32>
      %47 = vector.shape_cast %46 : vector<96xf32> to vector<96x1xf32>
      %48 = arith.addf %45, %47 : vector<96x1xf32>
      %c0_33 = arith.constant 0 : index
      %c0_34 = arith.constant 0 : index
      %49 = vector.load %arg8[%c0_33, %c0_34] : memref<96x1xf32, #tpu.memory_space<vmem>>, vector<96x1xf32>
      tpu.vector_store %arg8[%c0_33, %c0_34], %48 {strides = array<i32>} : memref<96x1xf32, #tpu.memory_space<vmem>>, vector<96x1xf32>,
      %c0_35 = arith.constant 0 : index
      %c0_36 = arith.constant 0 : index
      %50 = vector.load %arg9[%c0_35, %c0_36] : memref<96x1xf32, #tpu.memory_space<vmem>>, vector<96x1xf32>
      %51 = arith.mulf %44, %44 : vector<96x256xf32>
      %cst_37 = arith.constant dense<0.000000e+00> : vector<96xf32>
      %52 = vector.multi_reduction <add>, %51, %cst_37 [1] : vector<96x256xf32> to vector<96xf32>
      %53 = vector.shape_cast %52 : vector<96xf32> to vector<96x1xf32>
      %54 = arith.addf %50, %53 : vector<96x1xf32>
      %c0_38 = arith.constant 0 : index
      %c0_39 = arith.constant 0 : index
      %55 = vector.load %arg9[%c0_38, %c0_39] : memref<96x1xf32, #tpu.memory_space<vmem>>, vector<96x1xf32>
      tpu.vector_store %arg9[%c0_38, %c0_39], %54 {strides = array<i32>} : memref<96x1xf32, #tpu.memory_space<vmem>>, vector<96x1xf32>,
      %c2_i32_40 = arith.constant 2 : i32
      %56 = arith.muli %arg1, %c2_i32_40 : i32
      %c1_i32_41 = arith.constant 1 : i32
      %57 = arith.addi %56, %c1_i32_41 : i32
      %58 = arith.index_cast %57 : i32 to index
      %c0_42 = arith.constant 0 : index
      %c0_43 = arith.constant 0 : index
      %59 = vector.load %arg12[%58, %c0_42, %c0_43] : memref<2x96x256xf32, #tpu.memory_space<vmem>>, vector<1x96x256xf32>
      %60 = vector.shape_cast %59 : vector<1x96x256xf32> to vector<96x256xf32>
      %61 = vector.shape_cast %44 : vector<96x256xf32> to vector<1x96x256xf32>
      tpu.vector_store %arg12[%58, %c0_42, %c0_43], %61 {strides = array<i32>} : memref<2x96x256xf32, #tpu.memory_space<vmem>>, vector<1x96x256xf32>,
    } else {
    }
    %c1_i32 = arith.constant 1 : i32
    %10 = arith.cmpi eq, %arg0, %c1_i32 : i32
    %11 = arith.andi %10, %2 : i1
    %12 = arith.extui %11 : i1 to i32
    %c0_i32_5 = arith.constant 0 : i32
    %13 = arith.cmpi ne, %12, %c0_i32_5 : i32
    scf.if %13 {
      %c0 = arith.constant 0 : index
      %c0_8 = arith.constant 0 : index
      %17 = vector.load %arg8[%c0, %c0_8] : memref<96x1xf32, #tpu.memory_space<vmem>>, vector<96x1xf32>
      %cst = arith.constant 0.001953125 : f32
      %18 = vector.broadcast %cst : f32 to vector<96x1xf32>
      %19 = arith.mulf %17, %18 : vector<96x1xf32>
      %c0_9 = arith.constant 0 : index
      %c0_10 = arith.constant 0 : index
      %20 = vector.load %arg9[%c0_9, %c0_10] : memref<96x1xf32, #tpu.memory_space<vmem>>, vector<96x1xf32>
      %cst_11 = arith.constant 0.001953125 : f32
      %21 = vector.broadcast %cst_11 : f32 to vector<96x1xf32>
      %22 = arith.mulf %20, %21 : vector<96x1xf32>
      %23 = arith.mulf %19, %19 : vector<96x1xf32>
      %24 = arith.subf %22, %23 : vector<96x1xf32>
      %cst_12 = arith.constant 0.000000e+00 : f32
      %25 = vector.broadcast %cst_12 : f32 to vector<96x1xf32>
      %26 = arith.maximumf %24, %25 : vector<96x1xf32>
      %c0_13 = arith.constant 0 : index
      %c0_14 = arith.constant 0 : index
      %27 = vector.load %arg5[%c0_13, %c0_14] : memref<96x1xf32, #tpu.memory_space<vmem>>, vector<96x1xf32>
      %cst_15 = arith.constant 9.99999974E-6 : f32
      %28 = vector.broadcast %cst_15 : f32 to vector<96x1xf32>
      %29 = arith.addf %26, %28 : vector<96x1xf32>
      %30 = math.rsqrt %29 : vector<96x1xf32>
      %31 = arith.mulf %27, %30 : vector<96x1xf32>
      %c0_16 = arith.constant 0 : index
      %c0_17 = arith.constant 0 : index
      %32 = vector.load %arg10[%c0_16, %c0_17] : memref<96x1xf32, #tpu.memory_space<vmem>>, vector<96x1xf32>
      tpu.vector_store %arg10[%c0_16, %c0_17], %31 {strides = array<i32>} : memref<96x1xf32, #tpu.memory_space<vmem>>, vector<96x1xf32>,
      %c0_18 = arith.constant 0 : index
      %c0_19 = arith.constant 0 : index
      %33 = vector.load %arg6[%c0_18, %c0_19] : memref<96x1xf32, #tpu.memory_space<vmem>>, vector<96x1xf32>
      %34 = arith.mulf %19, %31 : vector<96x1xf32>
      %35 = arith.subf %33, %34 : vector<96x1xf32>
      %c0_20 = arith.constant 0 : index
      %c0_21 = arith.constant 0 : index
      %36 = vector.load %arg11[%c0_20, %c0_21] : memref<96x1xf32, #tpu.memory_space<vmem>>, vector<96x1xf32>
      tpu.vector_store %arg11[%c0_20, %c0_21], %35 {strides = array<i32>} : memref<96x1xf32, #tpu.memory_space<vmem>>, vector<96x1xf32>,
    } else {
    }
    %c1_i32_6 = arith.constant 1 : i32
    %14 = arith.cmpi eq, %arg0, %c1_i32_6 : i32
    %15 = arith.extui %14 : i1 to i32
    %c0_i32_7 = arith.constant 0 : i32
    %16 = arith.cmpi ne, %15, %c0_i32_7 : i32
    scf.if %16 {
      %c0 = arith.constant 0 : index
      %c0_8 = arith.constant 0 : index
      %17 = vector.load %arg10[%c0, %c0_8] : memref<96x1xf32, #tpu.memory_space<vmem>>, vector<96x1xf32>
      %c0_9 = arith.constant 0 : index
      %c0_10 = arith.constant 0 : index
      %18 = vector.load %arg11[%c0_9, %c0_10] : memref<96x1xf32, #tpu.memory_space<vmem>>, vector<96x1xf32>
      %c2_i32 = arith.constant 2 : i32
      %19 = arith.muli %arg1, %c2_i32 : i32
      %c0_i32_11 = arith.constant 0 : i32
      %20 = arith.addi %19, %c0_i32_11 : i32
      %21 = arith.index_cast %20 : i32 to index
      %c0_12 = arith.constant 0 : index
      %c0_13 = arith.constant 0 : index
      %22 = vector.load %arg12[%21, %c0_12, %c0_13] : memref<2x96x256xf32, #tpu.memory_space<vmem>>, vector<1x96x256xf32>
      %23 = vector.shape_cast %22 : vector<1x96x256xf32> to vector<96x256xf32>
      %24 = vector.broadcast %17 : vector<96x1xf32> to vector<96x256xf32>
      %25 = arith.mulf %23, %24 : vector<96x256xf32>
      %26 = vector.broadcast %18 : vector<96x1xf32> to vector<96x256xf32>
      %27 = arith.addf %25, %26 : vector<96x256xf32>
      %c0_14 = arith.constant 0 : index
      %c0_15 = arith.constant 0 : index
      %c0_16 = arith.constant 0 : index
      %28 = vector.load %arg7[%c0_14, %c0_15, %c0_16] : memref<2x96x256xf32, #tpu.memory_space<vmem>>, vector<1x96x256xf32>
      %29 = vector.shape_cast %28 : vector<1x96x256xf32> to vector<96x256xf32>
      %30 = vector.shape_cast %27 : vector<96x256xf32> to vector<1x96x256xf32>
      tpu.vector_store %arg7[%c0_14, %c0_15, %c0_16], %30 {strides = array<i32>} : memref<2x96x256xf32, #tpu.memory_space<vmem>>, vector<1x96x256xf32>,
      %c2_i32_17 = arith.constant 2 : i32
      %31 = arith.muli %arg1, %c2_i32_17 : i32
      %c1_i32_18 = arith.constant 1 : i32
      %32 = arith.addi %31, %c1_i32_18 : i32
      %33 = arith.index_cast %32 : i32 to index
      %c0_19 = arith.constant 0 : index
      %c0_20 = arith.constant 0 : index
      %34 = vector.load %arg12[%33, %c0_19, %c0_20] : memref<2x96x256xf32, #tpu.memory_space<vmem>>, vector<1x96x256xf32>
      %35 = vector.shape_cast %34 : vector<1x96x256xf32> to vector<96x256xf32>
      %36 = vector.broadcast %17 : vector<96x1xf32> to vector<96x256xf32>
      %37 = arith.mulf %35, %36 : vector<96x256xf32>
      %38 = vector.broadcast %18 : vector<96x1xf32> to vector<96x256xf32>
      %39 = arith.addf %37, %38 : vector<96x256xf32>
      %c1 = arith.constant 1 : index
      %c0_21 = arith.constant 0 : index
      %c0_22 = arith.constant 0 : index
      %40 = vector.load %arg7[%c1, %c0_21, %c0_22] : memref<2x96x256xf32, #tpu.memory_space<vmem>>, vector<1x96x256xf32>
      %41 = vector.shape_cast %40 : vector<1x96x256xf32> to vector<96x256xf32>
      %42 = vector.shape_cast %39 : vector<96x256xf32> to vector<1x96x256xf32>
      tpu.vector_store %arg7[%c1, %c0_21, %c0_22], %42 {strides = array<i32>} : memref<2x96x256xf32, #tpu.memory_space<vmem>>, vector<1x96x256xf32>,
    } else {
    }
    return
  }
  func.func @transform_0(%arg0: i32, %arg1: i32, %arg2: i32) -> (i32, i32, i32) {
    %c1_i32 = arith.constant 1 : i32
    %0 = arith.subi %c1_i32, %arg0 : i32
    %1 = arith.muli %0, %arg1 : i32
    %c1_i32_0 = arith.constant 1 : i32
    %2 = arith.subi %c1_i32_0, %arg0 : i32
    %3 = arith.muli %2, %arg2 : i32
    %c0_i32 = arith.constant 0 : i32
    %c0_i32_1 = arith.constant 0 : i32
    return %1, %c0_i32, %3 : i32, i32, i32
  }
  func.func @transform_1(%arg0: i32, %arg1: i32, %arg2: i32) -> (i32, i32) {
    %c0_i32 = arith.constant 0 : i32
    %c0_i32_0 = arith.constant 0 : i32
    %c0_i32_1 = arith.constant 0 : i32
    return %c0_i32, %c0_i32_0 : i32, i32
  }
  func.func @transform_2(%arg0: i32, %arg1: i32, %arg2: i32) -> (i32, i32) {
    %c0_i32 = arith.constant 0 : i32
    %c0_i32_0 = arith.constant 0 : i32
    %c0_i32_1 = arith.constant 0 : i32
    return %c0_i32, %c0_i32_0 : i32, i32
  }
  func.func @transform_3(%arg0: i32, %arg1: i32, %arg2: i32) -> (i32, i32) {
    %c0_i32 = arith.constant 0 : i32
    %c0_i32_0 = arith.constant 0 : i32
    %c0_i32_1 = arith.constant 0 : i32
    return %c0_i32, %c0_i32_0 : i32, i32
  }
  func.func @transform_4(%arg0: i32, %arg1: i32, %arg2: i32) -> (i32, i32, i32) {
    %0 = arith.muli %arg0, %arg1 : i32
    %1 = arith.muli %arg0, %arg2 : i32
    %c0_i32 = arith.constant 0 : i32
    %c0_i32_0 = arith.constant 0 : i32
    return %0, %c0_i32, %1 : i32, i32, i32
  }
}

</mosaic_0001>

<bundles_post_ra>
// kernel: tpu_custom_call.1
= control target key start
LH: loop header
LB: loop body
LE: loop exit
PB: predicated region body
PF: predicated region fallthrough
CT: control target
= control target key end

     0   :  { %9 = vsyncpa [#allocation8], 0  ;;  %s2698_s0 = inlined_call_operand.hbm [shape: f32[2,96,256], index: 0, kind: input, shape index: {}]   ;;  %s2699_s1 = inlined_call_operand.vmem [shape: f32[96,96], index: 1, kind: input, shape index: {}]   ;;  %s2700_s2 = inlined_call_operand.vmem [shape: f32[96,1], index: 2, kind: input, shape index: {}]   ;;  %s2701_s3 = inlined_call_operand.vmem [shape: f32[96,1], index: 3, kind: input, shape index: {}]   ;;  %s2702_s4 = inlined_call_operand.hbm [shape: f32[2,96,256], index: 4, kind: output, shape index: {}]  }
   0x1   :  { %11 = vsyncpa [#allocation8 + $0x1], 0 }
   0x2   :  { %12 = vsyncpa [#allocation9], 0 }
   0x3   :  { %14 = vsyncpa [#allocation9 + $0x1], 0  ;;  %s2167_s15 = smov 0   ;;  %s2169_s16 = smov 0  }
   0x4   :  { %s2171_s17 = smov 0  }
   0x5 LB: > { %s1781_s18 = sadd.s32 4294967295, %s2131_s17   ;;  %s1782_s19 = sadd.s32 4294967294, %s2131_s17   ;;  %s2131_s17 = sphi %s2171_s17, %s20_s17   ;;  %s2127_s16 = sphi %s2169_s16, %s2708_s16   ;;  %s2123_s15 = sphi %s2167_s15, %s2707_s15  }
   0x6   : > { %s39_s20 = sadd.s32 1, %s2127_s16  ;;  %p1982_p2 = scmp.lt.s32.totalorder %s2131_s17, 2 }
   0x7   : > { %p41_p1 = scmp.ge.s32.totalorder %s39_s20, 2  ;;  %p1983_p3 = scmp.eq.s32.totalorder %s2131_s17, 0 }
   0x8   : > { %s2133_s22 = smov [#allocation7]   ;;  %s2047_s26 = scalar_lea.hbm %s2698_s0, 6144 }
   0x9   : > { %s2710_s20 = smov (%p41_p1, %s39_s20), 0  ;;  %p2190_p4 = pnand %p1983_p3, %p1982_p2 }
   0xa   : > { %s212_s23 = sshll.u32 %s2133_s22, 4  ;;  %p2048_p6 = scmp.ne.s32.totalorder %s2698_s0, %s2047_s26  ;;  %s213_s23 = int_to_ptr.vmem [resolvable:$true] %s212_s23 }
   0xb   : > { %p2049_p7 = pneg %p2190_p4  ;;  %p2054_p10 = scmp.lt.u32.totalorder %s2047_s26, %s2698_s0 }
   0xd   : > { %p2050_p8 = pnand %p2049_p7, %p2048_p6 }
   0xf   : > { %p2051_p9 = pneg %p2050_p8 }
  0x11   : > { %p2056_p11 = pnand %p2054_p10, %p2051_p9 }
  0x13   : > { %2059 = shalt.err (!%p2056_p11)
}
  0x14   : > { %s2060_s5 = scalar_lea.vmem %s213_s23, 6144  ;;  %s2067_s6 = scalar_lea.vmem %s213_s23, 12288 }
  0x15   : > { %p2061_p12 = scmp.ne.s32.totalorder %s213_s23, %s2060_s5  ;;  %p2068_p2 = scmp.lt.s32.totalorder %s213_s23, %s213_s23 }
  0x16   : > { %p2069_p3 = scmp.lt.s32.totalorder %s2067_s6, %s2060_s5 }
  0x17   : > { %p2063_p13 = pnand %p2061_p12, %p2049_p7 }
  0x18   : > { %p2070_p0 = por %p2069_p3, %p2068_p2 }
  0x19   : > { %p2064_p1 = pneg %p2063_p13 }
  0x1b   : > { %p2071_p5 = pnand %p2070_p0, %p2064_p1 }
  0x1d   : > { %2074 = shalt.err (!%p2071_p5)
}
  0x1e   : > { %s2134_s7 = smov 256   ;;  %s2135_s8 = smov 16  }
  0x1f   : > { %1977 = dma.hbm_to_vmem [thread:$0]  (!%p2190_p4), %s2698_s0, 6144, %s213_s23, [#allocation8], %s2134_s7, %s2134_s7, %s2135_s8  }
  0x20   : > { %p220_p6 = scmp.lt.s32.totalorder %s2131_s17, 3  ;;  %p2704_p8 = scmp.ge.s32.totalorder %s2131_s17, 1 }
  0x22   : > { %p221_p7 = pnand %p2704_p8, %p220_p6 }
  0x23   : > { %p1984_p9 = scmp.eq.s32.totalorder (!%p221_p7), %s1781_s18, 0 }
  0x24   : > { %224 = sbr.rel (%p221_p7) target bundleno = 797 (0x31d), region = 36 }
  0x2b   : > { %2114 = dma.done.wait (%p1984_p9), [#allocation8], 6144  }
  0x2c   : > { %2116 = vsyncadd (%p1984_p9), [#allocation8], 4294961152  ;;  %p268_p0 = scmp.eq.s32.totalorder %s2123_s15, 0 }
  0x2d   : > { %vm273_vm0 = vcmask (%p268_p0), 7168   ;;  %v2136_v0 = vmov (%p268_p0), 0.0  }
  0x2e   : > { %272 = sbr.rel (!%p268_p0) target bundleno = 58 (0x3a), region = 44  ;;  %274 = vst.msk [vmem:[#allocation2] sm:$0xff] (%p268_p0), %vm273_vm0, %v2136_v0  ;;  %275 = vst.msk [vmem:[#allocation2 + $0x8] sm:$0xff] (%p268_p0), %vm273_vm0, %v2136_v0 }
  0x2f   : > { %276 = vst.msk [vmem:[#allocation2 + $0x10] sm:$0xff] (%p268_p0), %vm273_vm0, %v2136_v0  ;;  %277 = vst.msk [vmem:[#allocation2 + $0x18] sm:$0xff] (%p268_p0), %vm273_vm0, %v2136_v0 }
  0x30   : > { %278 = vst.msk [vmem:[#allocation2 + $0x20] sm:$0xff] (%p268_p0), %vm273_vm0, %v2136_v0  ;;  %279 = vst.msk [vmem:[#allocation2 + $0x28] sm:$0xff] (%p268_p0), %vm273_vm0, %v2136_v0 }
  0x31   : > { %280 = vst.msk [vmem:[#allocation2 + $0x30] sm:$0xff] (%p268_p0), %vm273_vm0, %v2136_v0  ;;  %281 = vst.msk [vmem:[#allocation2 + $0x38] sm:$0xff] (%p268_p0), %vm273_vm0, %v2136_v0 }
  0x32   : > { %282 = vst.msk [vmem:[#allocation2 + $0x40] sm:$0xff] (%p268_p0), %vm273_vm0, %v2136_v0  ;;  %283 = vst.msk [vmem:[#allocation2 + $0x48] sm:$0xff] (%p268_p0), %vm273_vm0, %v2136_v0 }
  0x33   : > { %284 = vst.msk [vmem:[#allocation2 + $0x50] sm:$0xff] (%p268_p0), %vm273_vm0, %v2136_v0  ;;  %285 = vst.msk [vmem:[#allocation2 + $0x58] sm:$0xff] (%p268_p0), %vm273_vm0, %v2136_v0 }
  0x34   : > { %286 = vst.msk [vmem:[#allocation3] sm:$0xff] (%p268_p0), %vm273_vm0, %v2136_v0  ;;  %287 = vst.msk [vmem:[#allocation3 + $0x8] sm:$0xff] (%p268_p0), %vm273_vm0, %v2136_v0 }
  0x35   : > { %288 = vst.msk [vmem:[#allocation3 + $0x10] sm:$0xff] %vm273_vm0, %v2136_v0  ;;  %289 = vst.msk [vmem:[#allocation3 + $0x18] sm:$0xff] %vm273_vm0, %v2136_v0 }
  0x36   : > { %290 = vst.msk [vmem:[#allocation3 + $0x20] sm:$0xff] %vm273_vm0, %v2136_v0  ;;  %291 = vst.msk [vmem:[#allocation3 + $0x28] sm:$0xff] %vm273_vm0, %v2136_v0 }
  0x37   : > { %292 = vst.msk [vmem:[#allocation3 + $0x30] sm:$0xff] %vm273_vm0, %v2136_v0  ;;  %293 = vst.msk [vmem:[#allocation3 + $0x38] sm:$0xff] %vm273_vm0, %v2136_v0 }
  0x38   : > { %294 = vst.msk [vmem:[#allocation3 + $0x40] sm:$0xff] %vm273_vm0, %v2136_v0  ;;  %295 = vst.msk [vmem:[#allocation3 + $0x48] sm:$0xff] %vm273_vm0, %v2136_v0 }
  0x39   : > { %296 = vst.msk [vmem:[#allocation3 + $0x50] sm:$0xff] %vm273_vm0, %v2136_v0  ;;  %297 = vst.msk [vmem:[#allocation3 + $0x58] sm:$0xff] %vm273_vm0, %v2136_v0 }
  0x3a PF: > { %p1789_p4 = scmp.ne.s32.totalorder %s2123_s15, 0 }
  0x3b   : > { %v314_v1 = vld [vmem:[#allocation7 + $0x8] sm:$0xff] (!%p1789_p4)  ;;  %v316_v2 = vld [vmem:[#allocation7 + $0x18] sm:$0xff] (!%p1789_p4)  ;;  %v313_v6 = vld [vmem:[#allocation7] sm:$0xff] (!%p1789_p4)  ;;  %v2137_v8 = vmov (!%p1789_p4), 0.0   ;;  %vm337_vm1 = vcmask (!%p1789_p4), 785408   ;;  %vm595_vm2 = vcmask (!%p1789_p4), 7168  }
  0x3c   : > { %300 = sbr.rel (%p1789_p4) target bundleno = 545 (0x221), region = 48  ;;  %v1803_v3 = vld [vmem:[#allocation7 + $0xc8] sm:$0xff] (!%p1789_p4)  ;;  %v1918_v4 = vpack.c.bf16 (!%p1789_p4), %v316_v2, %v314_v1  ;;  %v1805_v5 = vld [vmem:[#allocation7 + $0xd8] sm:$0xff] (!%p1789_p4)  ;;  %v315_v7 = vld [vmem:[#allocation7 + $0x10] sm:$0xff] (!%p1789_p4)  ;;  %438 = vmatprep.mubr.f32.mxu0 (!%p1789_p4), %v2137_v8  ;;  %821 = vmatprep.mubr.f32.mxu1 (!%p1789_p4), %v2137_v8 }
  0x3d   : > { %v1942_v9 = vpack.c.bf16 (!%p1789_p4), %v1805_v5, %v1803_v3  ;;  %v1920_v10 = vpack.c.bf16 (!%p1789_p4), %v315_v7, %v313_v6  ;;  %v1802_v11 = vld [vmem:[#allocation7 + $0xc0] sm:$0xff] (!%p1789_p4)  ;;  %v1804_v12 = vld [vmem:[#allocation7 + $0xd0] sm:$0xff] (!%p1789_p4)  ;;  %v318_v13 = vld [vmem:[#allocation7 + $0x28] sm:$0xff] (!%p1789_p4) }
  0x3e   : > { %1919 = vmatprep.subr.bf16.mxu0 (!%p1789_p4), %v1918_v4  ;;  %v1944_v14 = vpack.c.bf16 (!%p1789_p4), %v1804_v12, %v1802_v11  ;;  %v320_v15 = vld [vmem:[#allocation7 + $0x38] sm:$0xff] (!%p1789_p4)  ;;  %v1807_v16 = vld [vmem:[#allocation7 + $0xe8] sm:$0xff] (!%p1789_p4)  ;;  %v317_v20 = vld [vmem:[#allocation7 + $0x20] sm:$0xff] (!%p1789_p4) }
  0x3f   : > { %v1809_v17 = vld [vmem:[#allocation7 + $0xf8] sm:$0xff] (!%p1789_p4)  ;;  %1943 = vmatprep.subr.bf16.mxu1 (!%p1789_p4), %v1942_v9  ;;  %1921 = vmatpush1.bf16.msra.mxu0 (!%p1789_p4), %v1920_v10  ;;  %v1922_v18 = vpack.c.bf16 (!%p1789_p4), %v320_v15, %v318_v13  ;;  %v319_v21 = vld [vmem:[#allocation7 + $0x30] sm:$0xff] (!%p1789_p4)  ;;  %v1806_v22 = vld [vmem:[#allocation7 + $0xe0] sm:$0xff] (!%p1789_p4) }
  0x40   : > { %v1946_v19 = vpack.c.bf16 (!%p1789_p4), %v1809_v17, %v1807_v16  ;;  %1945 = vmatpush1.bf16.msra.mxu1 (!%p1789_p4), %v1944_v14  ;;  %v1924_v23 = vpack.c.bf16 (!%p1789_p4), %v319_v21, %v317_v20  ;;  %v1808_v24 = vld [vmem:[#allocation7 + $0xf0] sm:$0xff] (!%p1789_p4)  ;;  %v322_v25 = vld [vmem:[#allocation7 + $0x48] sm:$0xff] (!%p1789_p4)  ;;  %v324_v26 = vld [vmem:[#allocation7 + $0x58] sm:$0xff] (!%p1789_p4) }
  0x41   : > { %1923 = vmatprep.subr.bf16.mxu0 (!%p1789_p4), %v1922_v18  ;;  %v1948_v27 = vpack.c.bf16 (!%p1789_p4), %v1808_v24, %v1806_v22  ;;  %v1926_v28 = vpack.c.bf16 (!%p1789_p4), %v324_v26, %v322_v25  ;;  %v1811_v29 = vld [vmem:[#allocation7 + $0x108] sm:$0xff] (!%p1789_p4)  ;;  %v1813_v30 = vld [vmem:[#allocation7 + $0x118] sm:$0xff] (!%p1789_p4)  ;;  %v321_v31 = vld [vmem:[#allocation7 + $0x40] sm:$0xff] (!%p1789_p4) }
  0x42   : > { %1947 = vmatprep.subr.bf16.mxu1 (!%p1789_p4), %v1946_v19  ;;  %v1950_v32 = vpack.c.bf16 (!%p1789_p4), %v1813_v30, %v1811_v29  ;;  %v323_v33 = vld [vmem:[#allocation7 + $0x50] sm:$0xff] (!%p1789_p4)  ;;  %v1810_v34 = vld [vmem:[#allocation7 + $0x100] sm:$0xff] (!%p1789_p4)  ;;  %v326_v37 = vld [vmem:[#allocation7 + $0x68] sm:$0xff] (!%p1789_p4) }
  0x43   : > { %v1812_v35 = vld [vmem:[#allocation7 + $0x110] sm:$0xff]  ;;  %1925 = vmatpush1.bf16.msra.mxu0 %v1924_v23  ;;  %v1928_v36 = vpack.c.bf16 %v323_v33, %v321_v31  ;;  %v328_v38 = vld [vmem:[#allocation7 + $0x78] sm:$0xff]  ;;  %v1815_v39 = vld [vmem:[#allocation7 + $0x128] sm:$0xff] }
  0x44   : > { %1949 = vmatpush1.bf16.msra.mxu1 %v1948_v27  ;;  %1927 = vmatprep.subr.bf16.mxu0 %v1926_v28  ;;  %v1952_v40 = vpack.c.bf16 %v1812_v35, %v1810_v34  ;;  %v1930_v41 = vpack.c.bf16 %v328_v38, %v326_v37  ;;  %v1817_v42 = vld [vmem:[#allocation7 + $0x138] sm:$0xff]  ;;  %v325_v43 = vld [vmem:[#allocation7 + $0x60] sm:$0xff]  ;;  %v327_v44 = vld [vmem:[#allocation7 + $0x70] sm:$0xff] }
  0x45   : > { %1951 = vmatprep.subr.bf16.mxu1 %v1950_v32  ;;  %v1954_v45 = vpack.c.bf16 %v1817_v42, %v1815_v39  ;;  %v1814_v46 = vld [vmem:[#allocation7 + $0x120] sm:$0xff]  ;;  %v1816_v47 = vld [vmem:[#allocation7 + $0x130] sm:$0xff]  ;;  %v330_v48 = vld [vmem:[#allocation7 + $0x88] sm:$0xff]  ;;  %v1932_v52 = vpack.c.bf16 %v327_v44, %v325_v43 }
  0x46   : > { %v332_v49 = vld [vmem:[#allocation7 + $0x98] sm:$0xff]  ;;  %v1819_v50 = vld [vmem:[#allocation7 + $0x148] sm:$0xff]  ;;  %v1956_v53 = vpack.c.bf16 %v1816_v47, %v1814_v46  ;;  %v329_v55 = vld [vmem:[#allocation7 + $0x80] sm:$0xff] }
  0x47   : > { %v1821_v51 = vld [vmem:[#allocation7 + $0x158] sm:$0xff]  ;;  %1929 = vmatpush1.bf16.msra.mxu0 %v1928_v36  ;;  %v1934_v54 = vpack.c.bf16 %v332_v49, %v330_v48  ;;  %v331_v56 = vld [vmem:[#allocation7 + $0x90] sm:$0xff]  ;;  %v1818_v57 = vld [vmem:[#allocation7 + $0x140] sm:$0xff] }
  0x48   : > { %1953 = vmatpush1.bf16.msra.mxu1 %v1952_v40  ;;  %1931 = vmatprep.subr.bf16.mxu0 %v1930_v41  ;;  %v1958_v58 = vpack.c.bf16 %v1821_v51, %v1819_v50  ;;  %v1820_v59 = vld [vmem:[#allocation7 + $0x150] sm:$0xff]  ;;  %v334_v60 = vld [vmem:[#allocation7 + $0xa8] sm:$0xff]  ;;  %v336_v61 = vld [vmem:[#allocation7 + $0xb8] sm:$0xff]  ;;  %v1936_v0 = vpack.c.bf16 %v331_v56, %v329_v55 }
  0x49   : > { %1955 = vmatprep.subr.bf16.mxu1 %v1954_v45  ;;  %v1823_v62 = vld [vmem:[#allocation7 + $0x168] sm:$0xff]  ;;  %v1825_v63 = vld [vmem:[#allocation7 + $0x178] sm:$0xff]  ;;  %v1960_v1 = vpack.c.bf16 %v1820_v59, %v1818_v57  ;;  %v1938_v2 = vpack.c.bf16 %v336_v61, %v334_v60  ;;  %v333_v3 = vld [vmem:[#allocation7 + $0xa0] sm:$0xff] }
  0x4a   : > { %v335_v4 = vld [vmem:[#allocation7 + $0xb0] sm:$0xff]  ;;  %v1962_v5 = vpack.c.bf16 %v1825_v63, %v1823_v62  ;;  %v1822_v6 = vld [vmem:[#allocation7 + $0x160] sm:$0xff]  ;;  %v302_v12 = vld [vmem:[%s2699_s1 + $0x8] sm:$0xff] }
  0x4b   : > { %1933 = vmatpush1.bf16.msra.mxu0 %v1932_v52  ;;  %v1824_v7 = vld [vmem:[#allocation7 + $0x170] sm:$0xff]  ;;  %v1940_v9 = vpack.c.bf16 %v335_v4, %v333_v3  ;;  %v301_v11 = vld [vmem:[%s2699_s1] sm:$0xff]  ;;  %v304_v14 = vld [vmem:[%s2699_s1 + $0x18] sm:$0xff] }
  0x4c   : > { %1957 = vmatpush1.bf16.msra.mxu1 %v1956_v53  ;;  %1935 = vmatprep.subr.bf16.mxu0 %v1934_v54  ;;  %v1964_v10 = vpack.c.bf16 %v1824_v7, %v1822_v6  ;;  %v303_v13 = vld [vmem:[%s2699_s1 + $0x10] sm:$0xff]  ;;  %v305_v15 = vld [vmem:[%s2699_s1 + $0x20] sm:$0xff]  ;;  %v306_v16 = vld [vmem:[%s2699_s1 + $0x28] sm:$0xff] }
  0x4d   : > { %1959 = vmatprep.subr.bf16.mxu1 %v1958_v58  ;;  %v307_v17 = vld [vmem:[%s2699_s1 + $0x30] sm:$0xff]  ;;  %v308_v18 = vld [vmem:[%s2699_s1 + $0x38] sm:$0xff]  ;;  %v309_v19 = vld [vmem:[%s2699_s1 + $0x40] sm:$0xff] }
  0x4e   : > { %v310_v20 = vld [vmem:[%s2699_s1 + $0x48] sm:$0xff]  ;;  %v311_v21 = vld [vmem:[%s2699_s1 + $0x50] sm:$0xff]  ;;  %v312_v22 = vld [vmem:[%s2699_s1 + $0x58] sm:$0xff] }
  0x4f   : > { %1937 = vmatpush1.bf16.msra.mxu0 %v1936_v0 }
  0x50   : > { %1961 = vmatpush1.bf16.msra.mxu1 %v1960_v1  ;;  %1939 = vmatprep.subr.bf16.mxu0 %v1938_v2 }
  0x51   : > { %1963 = vmatprep.subr.bf16.mxu1 %v1962_v5 }
  0x53   : > { %1941 = vmatpush1.bf16.msra.mxu0 %v1940_v9 }
  0x54   : > { %1965 = vmatpush1.bf16.msra.mxu1 %v1964_v10 }
  0x56   : > { %1790 = vmatmul.mubr.msk.f32.vlgmr.msra.gmra.mrb[0].mxu0 %vm337_vm1, %v301_v11 }
  0x57   : > { %1826 = vmatmul.mubr.msk.f32.vlgmr.msra.gmra.mrb[0].mxu1 %vm337_vm1, %v301_v11  ;;  %444 = vmatprep.mubr.f32.mxu0 %v2137_v8 }
  0x58   : > { %827 = vmatprep.mubr.f32.mxu1 %v2137_v8 }
  0x5a   : > { %1791 = vmatmul.mubr.msk.f32.gmra.mrb[2].mxu0 %vm337_vm1, %v302_v12 }
  0x5b   : > { %1827 = vmatmul.mubr.msk.f32.gmra.mrb[2].mxu1 %vm337_vm1, %v302_v12  ;;  %450 = vmatprep.mubr.f32.mxu0 %v2137_v8 }
  0x5c   : > { %833 = vmatprep.mubr.f32.mxu1 %v2137_v8 }
  0x5e   : > { %1792 = vmatmul.mubr.msk.f32.gmra.mrb[4].mxu0 %vm337_vm1, %v303_v13 }
  0x5f   : > { %456 = vmatprep.mubr.f32.mxu0 %v2137_v8  ;;  %1828 = vmatmul.mubr.msk.f32.gmra.mrb[4].mxu1 %vm337_vm1, %v303_v13 }
  0x60   : > { %839 = vmatprep.mubr.f32.mxu1 %v2137_v8 }
  0x62   : > { %1793 = vmatmul.mubr.msk.f32.gmra.mrb[6].mxu0 %vm337_vm1, %v304_v14 }
  0x63   : > { %1829 = vmatmul.mubr.msk.f32.gmra.mrb[6].mxu1 %vm337_vm1, %v304_v14  ;;  %462 = vmatprep.mubr.f32.mxu0 %v2137_v8 }
  0x64   : > { %845 = vmatprep.mubr.f32.mxu1 %v2137_v8 }
  0x66   : > { %1794 = vmatmul.mubr.msk.f32.gmra.mrb[8].mxu0 %vm337_vm1, %v305_v15 }
  0x67   : > { %468 = vmatprep.mubr.f32.mxu0 %v2137_v8  ;;  %1830 = vmatmul.mubr.msk.f32.gmra.mrb[8].mxu1 %vm337_vm1, %v305_v15 }
  0x68   : > { %851 = vmatprep.mubr.f32.mxu1 %v2137_v8 }
  0x6a   : > { %1795 = vmatmul.mubr.msk.f32.gmra.mrb[10].mxu0 %vm337_vm1, %v306_v16 }
  0x6b   : > { %1831 = vmatmul.mubr.msk.f32.gmra.mrb[10].mxu1 %vm337_vm1, %v306_v16  ;;  %474 = vmatprep.mubr.f32.mxu0 %v2137_v8 }
  0x6c   : > { %857 = vmatprep.mubr.f32.mxu1 %v2137_v8 }
  0x6e   : > { %1796 = vmatmul.mubr.msk.f32.gmra.mrb[12].mxu0 %vm337_vm1, %v307_v17 }
  0x6f   : > { %480 = vmatprep.mubr.f32.mxu0 %v2137_v8  ;;  %1832 = vmatmul.mubr.msk.f32.gmra.mrb[12].mxu1 %vm337_vm1, %v307_v17 }
  0x70   : > { %863 = vmatprep.mubr.f32.mxu1 %v2137_v8 }
  0x72   : > { %1797 = vmatmul.mubr.msk.f32.gmra.mrb[14].mxu0 %vm337_vm1, %v308_v18 }
  0x73   : > { %1833 = vmatmul.mubr.msk.f32.gmra.mrb[14].mxu1 %vm337_vm1, %v308_v18  ;;  %486 = vmatprep.mubr.f32.mxu0 %v2137_v8 }
  0x74   : > { %869 = vmatprep.mubr.f32.mxu1 %v2137_v8 }
  0x76   : > { %1798 = vmatmul.mubr.msk.f32.gmra.mrb[16].mxu0 %vm337_vm1, %v309_v19 }
  0x77   : > { %492 = vmatprep.mubr.f32.mxu0 %v2137_v8  ;;  %1834 = vmatmul.mubr.msk.f32.gmra.mrb[16].mxu1 %vm337_vm1, %v309_v19 }
  0x78   : > { %875 = vmatprep.mubr.f32.mxu1 %v2137_v8 }
  0x7a   : > { %1799 = vmatmul.mubr.msk.f32.gmra.mrb[18].mxu0 %vm337_vm1, %v310_v20 }
  0x7b   : > { %1835 = vmatmul.mubr.msk.f32.gmra.mrb[18].mxu1 %vm337_vm1, %v310_v20  ;;  %498 = vmatprep.mubr.f32.mxu0 %v2137_v8 }
  0x7c   : > { %881 = vmatprep.mubr.f32.mxu1 %v2137_v8 }
  0x7e   : > { %1800 = vmatmul.mubr.msk.f32.gmra.mrb[20].mxu0 %vm337_vm1, %v311_v21 }
  0x7f   : > { %504 = vmatprep.mubr.f32.mxu0 %v2137_v8  ;;  %1836 = vmatmul.mubr.msk.f32.gmra.mrb[20].mxu1 %vm337_vm1, %v311_v21 }
  0x80   : > { %887 = vmatprep.mubr.f32.mxu1 %v2137_v8 }
  0x82   : > { %1801 = vmatmul.mubr.msk.f32.gmra.mrb[22].mxu0 %vm337_vm1, %v312_v22 }
  0x83   : > { %1837 = vmatmul.mubr.msk.f32.gmra.mrb[22].mxu1 %vm337_vm1, %v312_v22 }
 0x129   : > { %v440_v23 = vpop.f32.mrb[0].mxu0 }
 0x12a   : > { %v511_v24 = vmax.f32 %v440_v23, 0.0  ;;  %v823_v25 = vpop.f32.mrb[0].mxu1  ;;  %v442_v26 = vpop.f32.mrb[1].mxu0 }
 0x12b   : > { %v894_v27 = vmax.f32 %v823_v25, 0.0  ;;  %v512_v28 = vmax.f32 %v442_v26, 0.0  ;;  %v825_v29 = vpop.f32.mrb[1].mxu1 }
 0x12c   : > { %708 = vst [vmem:[#allocation6] sm:$0xff] %v511_v24  ;;  %v895_v30 = vmax.f32 %v825_v29, 0.0  ;;  %v620_v31 = vmul.f32 %v511_v24, %v511_v24 }
 0x12d   : > { %1838 = vst [vmem:[#allocation6 + $0xc0] sm:$0xff] %v894_v27  ;;  %709 = vst [vmem:[#allocation6 + $0x8] sm:$0xff] %v512_v28  ;;  %v446_v32 = vpop.f32.mrb[2].mxu0  ;;  %v547_v33 = vadd.f32 %v512_v28, %v511_v24  ;;  %v621_v34 = vmul.f32 %v512_v28, %v512_v28  ;;  %v1002_v8 = vmul.f32 %v894_v27, %v894_v27 }
 0x12e   : > { %1839 = vst [vmem:[#allocation6 + $0xc8] sm:$0xff] %v895_v30  ;;  %v829_v35 = vpop.f32.mrb[2].mxu1  ;;  %v513_v36 = vmax.f32 %v446_v32, 0.0  ;;  %v448_v37 = vpop.f32.mrb[3].mxu0  ;;  %v930_v38 = vadd.f32 %v895_v30, %v894_v27  ;;  %v1003_v39 = vmul.f32 %v895_v30, %v895_v30 }
 0x12f   : > { %v896_v40 = vmax.f32 %v829_v35, 0.0  ;;  %v831_v41 = vpop.f32.mrb[3].mxu1  ;;  %548 = vadd.xlane.f32.xlu0 %v547_v33  ;;  %v514_v42 = vmax.f32 %v448_v37, 0.0  ;;  %v644_v43 = vadd.f32 %v621_v34, %v620_v31 }
 0x130   : > { %710 = vst [vmem:[#allocation6 + $0x10] sm:$0xff] %v513_v36  ;;  %v897_v44 = vmax.f32 %v831_v41, 0.0  ;;  %v622_v45 = vmul.f32 %v513_v36, %v513_v36  ;;  %v1026_v46 = vadd.f32 %v1003_v39, %v1002_v8 }
 0x131   : > { %1840 = vst [vmem:[#allocation6 + $0xd0] sm:$0xff] %v896_v40  ;;  %711 = vst [vmem:[#allocation6 + $0x18] sm:$0xff] %v514_v42  ;;  %v623_v47 = vmul.f32 %v514_v42, %v514_v42  ;;  %v452_v48 = vpop.f32.mrb[4].mxu0  ;;  %v1004_v49 = vmul.f32 %v896_v40, %v896_v40  ;;  %v2326_v50 = vadd.f32 %v514_v42, %v513_v36 }
 0x132   : > { %1841 = vst [vmem:[#allocation6 + $0xd8] sm:$0xff] %v897_v44  ;;  %v933_v51 = vadd.f32 %v897_v44, %v896_v40  ;;  %v515_v52 = vmax.f32 %v452_v48, 0.0  ;;  %v454_v53 = vpop.f32.mrb[5].mxu0  ;;  %v1005_v54 = vmul.f32 %v897_v44, %v897_v44  ;;  %v835_v55 = vpop.f32.mrb[4].mxu1 }
 0x133   : > { %931 = vadd.xlane.f32.xlu0 %v930_v38  ;;  %v647_v56 = vadd.f32 %v623_v47, %v622_v45  ;;  %v516_v57 = vmax.f32 %v454_v53, 0.0  ;;  %v898_v58 = vmax.f32 %v835_v55, 0.0  ;;  %v837_v59 = vpop.f32.mrb[5].mxu1 }
 0x134   : > { %934 = vadd.xlane.f32.xlu1 %v933_v51  ;;  %712 = vst [vmem:[#allocation6 + $0x20] sm:$0xff] %v515_v52  ;;  %v1029_v60 = vadd.f32 %v1005_v54, %v1004_v49  ;;  %v899_v61 = vmax.f32 %v837_v59, 0.0  ;;  %v624_v62 = vmul.f32 %v515_v52, %v515_v52 }
 0x135   : > { %713 = vst [vmem:[#allocation6 + $0x28] sm:$0xff] %v516_v57  ;;  %v458_v63 = vpop.f32.mrb[6].mxu0  ;;  %1842 = vst [vmem:[#allocation6 + $0xe0] sm:$0xff] %v898_v58  ;;  %v553_v0 = vadd.f32 %v516_v57, %v515_v52  ;;  %v625_v1 = vmul.f32 %v516_v57, %v516_v57  ;;  %v1006_v2 = vmul.f32 %v898_v58, %v898_v58 }
 0x136   : > { %v517_v3 = vmax.f32 %v458_v63, 0.0  ;;  %v460_v4 = vpop.f32.mrb[7].mxu0  ;;  %1843 = vst [vmem:[#allocation6 + $0xe8] sm:$0xff] %v899_v61  ;;  %v841_v5 = vpop.f32.mrb[6].mxu1  ;;  %v2328_v6 = vadd.f32 %v899_v61, %v898_v58  ;;  %v1007_v7 = vmul.f32 %v899_v61, %v899_v61 }
 0x137   : > { %645 = vadd.xlane.f32.xlu0 %v644_v43  ;;  %v518_v9 = vmax.f32 %v460_v4, 0.0  ;;  %v900_v10 = vmax.f32 %v841_v5, 0.0  ;;  %v843_v11 = vpop.f32.mrb[7].mxu1  ;;  %v2330_v12 = vadd.f32 %v625_v1, %v624_v62 }
 0x138   : > { %648 = vadd.xlane.f32.xlu1 %v647_v56  ;;  %714 = vst [vmem:[#allocation6 + $0x30] sm:$0xff] %v517_v3  ;;  %v901_v13 = vmax.f32 %v843_v11, 0.0  ;;  %v2332_v14 = vadd.f32 %v1007_v7, %v1006_v2  ;;  %v626_v15 = vmul.f32 %v517_v3, %v517_v3 }
 0x139   : > { %715 = vst [vmem:[#allocation6 + $0x38] sm:$0xff] %v518_v9  ;;  %1844 = vst [vmem:[#allocation6 + $0xf0] sm:$0xff] %v900_v10  ;;  %v556_v16 = vadd.f32 %v518_v9, %v517_v3  ;;  %v464_v17 = vpop.f32.mrb[8].mxu0  ;;  %v627_v18 = vmul.f32 %v518_v9, %v518_v9  ;;  %v1008_v19 = vmul.f32 %v900_v10, %v900_v10 }
 0x13a   : > { %1845 = vst [vmem:[#allocation6 + $0xf8] sm:$0xff] %v901_v13  ;;  %v2334_v20 = vadd.f32 %v901_v13, %v900_v10  ;;  %v519_v21 = vmax.f32 %v464_v17, 0.0  ;;  %v466_v22 = vpop.f32.mrb[9].mxu0  ;;  %v847_v23 = vpop.f32.mrb[8].mxu1  ;;  %v1009_v24 = vmul.f32 %v901_v13, %v901_v13 }
 0x13b   : > { %1027 = vadd.xlane.f32.xlu0 %v1026_v46  ;;  %v520_v25 = vmax.f32 %v466_v22, 0.0  ;;  %v2336_v26 = vadd.f32 %v627_v18, %v626_v15  ;;  %v902_v27 = vmax.f32 %v847_v23, 0.0  ;;  %v849_v28 = vpop.f32.mrb[9].mxu1 }
 0x13c   : > { %1030 = vadd.xlane.f32.xlu1 %v1029_v60  ;;  %716 = vst [vmem:[#allocation6 + $0x40] sm:$0xff] %v519_v21  ;;  %v903_v29 = vmax.f32 %v849_v28, 0.0  ;;  %v2338_v30 = vadd.f32 %v1009_v24, %v1008_v19  ;;  %v628_v31 = vmul.f32 %v519_v21, %v519_v21 }
 0x13d   : > { %717 = vst [vmem:[#allocation6 + $0x48] sm:$0xff] %v520_v25  ;;  %v470_v32 = vpop.f32.mrb[10].mxu0  ;;  %1846 = vst [vmem:[#allocation6 + $0x100] sm:$0xff] %v902_v27  ;;  %v2340_v33 = vadd.f32 %v520_v25, %v519_v21  ;;  %v629_v34 = vmul.f32 %v520_v25, %v520_v25  ;;  %v1010_v8 = vmul.f32 %v902_v27, %v902_v27 }
 0x13e   : > { %v521_v35 = vmax.f32 %v470_v32, 0.0  ;;  %v472_v36 = vpop.f32.mrb[11].mxu0  ;;  %1847 = vst [vmem:[#allocation6 + $0x108] sm:$0xff] %v903_v29  ;;  %v853_v37 = vpop.f32.mrb[10].mxu1  ;;  %v2342_v38 = vadd.f32 %v903_v29, %v902_v27  ;;  %v1011_v39 = vmul.f32 %v903_v29, %v903_v29 }
 0x13f   : > { %551 = vadd.xlane.f32.xlu0 %v2326_v50  ;;  %v522_v40 = vmax.f32 %v472_v36, 0.0  ;;  %v904_v41 = vmax.f32 %v853_v37, 0.0  ;;  %v855_v42 = vpop.f32.mrb[11].mxu1  ;;  %v2345_v43 = vadd.f32 %v629_v34, %v628_v31 }
 0x140   : > { %554 = vadd.xlane.f32.xlu1 %v553_v0  ;;  %718 = vst [vmem:[#allocation6 + $0x50] sm:$0xff] %v521_v35  ;;  %v905_v44 = vmax.f32 %v855_v42, 0.0  ;;  %v2347_v45 = vadd.f32 %v1011_v39, %v1010_v8  ;;  %v630_v46 = vmul.f32 %v521_v35, %v521_v35 }
 0x141   : > { %719 = vst [vmem:[#allocation6 + $0x58] sm:$0xff] %v522_v40  ;;  %1848 = vst [vmem:[#allocation6 + $0x110] sm:$0xff] %v904_v41  ;;  %v2349_v47 = vadd.f32 %v522_v40, %v521_v35  ;;  %v476_v48 = vpop.f32.mrb[12].mxu0  ;;  %v631_v49 = vmul.f32 %v522_v40, %v522_v40  ;;  %v1012_v51 = vmul.f32 %v904_v41, %v904_v41 }
 0x142   : > { %1849 = vst [vmem:[#allocation6 + $0x118] sm:$0xff] %v905_v44  ;;  %v2351_v50 = vadd.f32 %v905_v44, %v904_v41  ;;  %v523_v52 = vmax.f32 %v476_v48, 0.0  ;;  %v478_v53 = vpop.f32.mrb[13].mxu0  ;;  %v859_v54 = vpop.f32.mrb[12].mxu1  ;;  %v1013_v55 = vmul.f32 %v905_v44, %v905_v44 }
 0x143   : > { %937 = vadd.xlane.f32.xlu0 %v2328_v6  ;;  %v524_v56 = vmax.f32 %v478_v53, 0.0  ;;  %v2354_v57 = vadd.f32 %v631_v49, %v630_v46  ;;  %v906_v58 = vmax.f32 %v859_v54, 0.0  ;;  %v861_v59 = vpop.f32.mrb[13].mxu1 }
 0x144   : > { %557 = vadd.xlane.f32.xlu1 %v556_v16  ;;  %720 = vst [vmem:[#allocation6 + $0x60] sm:$0xff] %v523_v52  ;;  %v907_v60 = vmax.f32 %v861_v59, 0.0  ;;  %v2356_v61 = vadd.f32 %v1013_v55, %v1012_v51  ;;  %v632_v62 = vmul.f32 %v523_v52, %v523_v52 }
 0x145   : > { %721 = vst [vmem:[#allocation6 + $0x68] sm:$0xff] %v524_v56  ;;  %v482_v63 = vpop.f32.mrb[14].mxu0  ;;  %1850 = vst [vmem:[#allocation6 + $0x120] sm:$0xff] %v906_v58  ;;  %v2358_v0 = vadd.f32 %v524_v56, %v523_v52  ;;  %v633_v1 = vmul.f32 %v524_v56, %v524_v56  ;;  %v1014_v2 = vmul.f32 %v906_v58, %v906_v58 }
 0x146   : > { %v525_v3 = vmax.f32 %v482_v63, 0.0  ;;  %v484_v4 = vpop.f32.mrb[15].mxu0  ;;  %1851 = vst [vmem:[#allocation6 + $0x128] sm:$0xff] %v907_v60  ;;  %v865_v5 = vpop.f32.mrb[14].mxu1  ;;  %v2360_v6 = vadd.f32 %v907_v60, %v906_v58  ;;  %v1015_v7 = vmul.f32 %v907_v60, %v907_v60 }
 0x147   : > { %651 = vadd.xlane.f32.xlu0 %v2330_v12  ;;  %v526_v9 = vmax.f32 %v484_v4, 0.0  ;;  %v908_v10 = vmax.f32 %v865_v5, 0.0  ;;  %v867_v11 = vpop.f32.mrb[15].mxu1  ;;  %v2363_v13 = vadd.f32 %v633_v1, %v632_v62 }
 0x148   : > { %940 = vadd.xlane.f32.xlu1 %v2334_v20  ;;  %722 = vst [vmem:[#allocation6 + $0x70] sm:$0xff] %v525_v3  ;;  %v909_v15 = vmax.f32 %v867_v11, 0.0  ;;  %v634_v16 = vmul.f32 %v525_v3, %v525_v3  ;;  %v2366_v17 = vadd.f32 %v1015_v7, %v1014_v2 }
 0x149   : > { %723 = vst [vmem:[#allocation6 + $0x78] sm:$0xff] %v526_v9  ;;  %1852 = vst [vmem:[#allocation6 + $0x130] sm:$0xff] %v908_v10  ;;  %v2368_v18 = vadd.f32 %v526_v9, %v525_v3  ;;  %v488_v19 = vpop.f32.mrb[16].mxu0  ;;  %v635_v21 = vmul.f32 %v526_v9, %v526_v9  ;;  %v1016_v22 = vmul.f32 %v908_v10, %v908_v10 }
 0x14a   : > { %1853 = vst [vmem:[#allocation6 + $0x138] sm:$0xff] %v909_v15  ;;  %v527_v12 = vmax.f32 %v488_v19, 0.0  ;;  %v490_v23 = vpop.f32.mrb[17].mxu0  ;;  %v2370_v24 = vadd.f32 %v909_v15, %v908_v10  ;;  %v871_v25 = vpop.f32.mrb[16].mxu1  ;;  %v1017_v27 = vmul.f32 %v909_v15, %v909_v15 }
 0x14b   : > { %1033 = vadd.xlane.f32.xlu0 %v2332_v14  ;;  %v528_v20 = vmax.f32 %v490_v23, 0.0  ;;  %v910_v28 = vmax.f32 %v871_v25, 0.0  ;;  %v873_v29 = vpop.f32.mrb[17].mxu1  ;;  %v2373_v31 = vadd.f32 %v635_v21, %v634_v16 }
 0x14c   : > { %654 = vadd.xlane.f32.xlu1 %v2336_v26  ;;  %724 = vst [vmem:[#allocation6 + $0x80] sm:$0xff] %v527_v12  ;;  %v911_v32 = vmax.f32 %v873_v29, 0.0  ;;  %v636_v34 = vmul.f32 %v527_v12, %v527_v12  ;;  %v2376_v8 = vadd.f32 %v1017_v27, %v1016_v22 }
 0x14d   : > { %725 = vst [vmem:[#allocation6 + $0x88] sm:$0xff] %v528_v20  ;;  %v494_v35 = vpop.f32.mrb[18].mxu0  ;;  %1854 = vst [vmem:[#allocation6 + $0x140] sm:$0xff] %v910_v28  ;;  %v2378_v36 = vadd.f32 %v528_v20, %v527_v12  ;;  %v637_v37 = vmul.f32 %v528_v20, %v528_v20  ;;  %v1018_v39 = vmul.f32 %v910_v28, %v910_v28 }
 0x14e   : > { %v529_v14 = vmax.f32 %v494_v35, 0.0  ;;  %v496_v40 = vpop.f32.mrb[19].mxu0  ;;  %1855 = vst [vmem:[#allocation6 + $0x148] sm:$0xff] %v911_v32  ;;  %v877_v41 = vpop.f32.mrb[18].mxu1  ;;  %v2380_v42 = vadd.f32 %v911_v32, %v910_v28  ;;  %v1019_v44 = vmul.f32 %v911_v32, %v911_v32 }
 0x14f   : > { %560 = vadd.xlane.f32.xlu0 %v2340_v33  ;;  %v530_v26 = vmax.f32 %v496_v40, 0.0  ;;  %v912_v46 = vmax.f32 %v877_v41, 0.0  ;;  %v879_v48 = vpop.f32.mrb[19].mxu1  ;;  %v2383_v49 = vadd.f32 %v637_v37, %v636_v34  ;;  %v536_v41 = vld [vmem:[#allocation2 + $0x8] sm:$0xff] }
 0x150   : > { %1036 = vadd.xlane.f32.xlu1 %v2338_v30  ;;  %726 = vst [vmem:[#allocation6 + $0x90] sm:$0xff] %v529_v14  ;;  %v913_v51 = vmax.f32 %v879_v48, 0.0  ;;  %v638_v52 = vmul.f32 %v529_v14, %v529_v14  ;;  %v2386_v53 = vadd.f32 %v1019_v44, %v1018_v39 }
 0x151   : > { %727 = vst [vmem:[#allocation6 + $0x98] sm:$0xff] %v530_v26  ;;  %1856 = vst [vmem:[#allocation6 + $0x150] sm:$0xff] %v912_v46  ;;  %v574_v54 = vadd.f32 %v530_v26, %v529_v14  ;;  %v500_v55 = vpop.f32.mrb[20].mxu0  ;;  %v639_v56 = vmul.f32 %v530_v26, %v530_v26  ;;  %v1020_v58 = vmul.f32 %v912_v46, %v912_v46 }
 0x152   : > { %1857 = vst [vmem:[#allocation6 + $0x158] sm:$0xff] %v913_v51  ;;  %v531_v33 = vmax.f32 %v500_v55, 0.0  ;;  %v502_v59 = vpop.f32.mrb[21].mxu0  ;;  %v957_v60 = vadd.f32 %v913_v51, %v912_v46  ;;  %v883_v62 = vpop.f32.mrb[20].mxu1  ;;  %v1021_v63 = vmul.f32 %v913_v51, %v913_v51 }
 0x153   : > { %943 = vadd.xlane.f32.xlu0 %v2342_v38  ;;  %v532_v30 = vmax.f32 %v502_v59, 0.0  ;;  %v914_v1 = vmax.f32 %v883_v62, 0.0  ;;  %v885_v2 = vpop.f32.mrb[21].mxu1  ;;  %v671_v3 = vadd.f32 %v639_v56, %v638_v52 }
 0x154   : > { %563 = vadd.xlane.f32.xlu1 %v2349_v47  ;;  %728 = vst [vmem:[#allocation6 + $0xa0] sm:$0xff] %v531_v33  ;;  %v915_v4 = vmax.f32 %v885_v2, 0.0  ;;  %v640_v5 = vmul.f32 %v531_v33, %v531_v33  ;;  %v1053_v7 = vadd.f32 %v1021_v63, %v1020_v58  ;;  %v611_v2 = vld [vmem:[#allocation3 + $0x18] sm:$0xff] }
 0x155   : > { %729 = vst [vmem:[#allocation6 + $0xa8] sm:$0xff] %v532_v30  ;;  %v506_v9 = vpop.f32.mrb[22].mxu0  ;;  %1858 = vst [vmem:[#allocation6 + $0x160] sm:$0xff] %v914_v1  ;;  %v577_v10 = vadd.f32 %v532_v30, %v531_v33  ;;  %v641_v11 = vmul.f32 %v532_v30, %v532_v30  ;;  %v1022_v15 = vmul.f32 %v914_v1, %v914_v1  ;;  %v610_v33 = vld [vmem:[#allocation3 + $0x10] sm:$0xff] }
 0x156   : > { %v533_v16 = vmax.f32 %v506_v9, 0.0  ;;  %v508_v19 = vpop.f32.mrb[23].mxu0  ;;  %1859 = vst [vmem:[#allocation6 + $0x168] sm:$0xff] %v915_v4  ;;  %v889_v38 = vpop.f32.mrb[22].mxu1  ;;  %v960_v21 = vadd.f32 %v915_v4, %v914_v1  ;;  %v1023_v22 = vmul.f32 %v915_v4, %v915_v4  ;;  %v539_v9 = vld [vmem:[#allocation2 + $0x20] sm:$0xff] }
 0x157   : > { %657 = vadd.xlane.f32.xlu0 %v2345_v43  ;;  %v534_v12 = vmax.f32 %v508_v19, 0.0  ;;  %v916_v47 = vmax.f32 %v889_v38, 0.0  ;;  %v891_v23 = vpop.f32.mrb[23].mxu1  ;;  %v674_v25 = vadd.f32 %v641_v11, %v640_v5 }
 0x158   : > { %946 = vadd.xlane.f32.xlu1 %v2351_v50  ;;  %730 = vst [vmem:[#allocation6 + $0xb0] sm:$0xff] %v533_v16  ;;  %v917_v27 = vmax.f32 %v891_v23, 0.0  ;;  %v642_v20 = vmul.f32 %v533_v16, %v533_v16  ;;  %v1056_v28 = vadd.f32 %v1023_v22, %v1022_v15  ;;  %v540_v22 = vld [vmem:[#allocation2 + $0x28] sm:$0xff] }
 0x159   : > { %731 = vst [vmem:[#allocation6 + $0xb8] sm:$0xff] %v534_v12  ;;  %1860 = vst [vmem:[#allocation6 + $0x170] sm:$0xff] %v916_v47  ;;  %v580_v29 = vadd.f32 %v534_v12, %v533_v16  ;;  %v643_v32 = vmul.f32 %v534_v12, %v534_v12  ;;  %v1024_v34 = vmul.f32 %v916_v47, %v916_v47 }
 0x15a   : > { %1861 = vst [vmem:[#allocation6 + $0x178] sm:$0xff] %v917_v27  ;;  %v963_v35 = vadd.f32 %v917_v27, %v916_v47  ;;  %v1025_v37 = vmul.f32 %v917_v27, %v917_v27 }
 0x15b   : > { %1039 = vadd.xlane.f32.xlu0 %v2347_v45  ;;  %v677_v43 = vadd.f32 %v643_v32, %v642_v20  ;;  %v535_v45 = vld [vmem:[#allocation2] sm:$0xff] }
 0x15c   : > { %660 = vadd.xlane.f32.xlu1 %v2354_v57  ;;  %v1059_v39 = vadd.f32 %v1025_v37, %v1024_v34  ;;  %v613_v37 = vld [vmem:[#allocation3 + $0x28] sm:$0xff] }
 0x15f   : > { %566 = vadd.xlane.f32.xlu0 %v2358_v0 }
 0x160   : > { %1042 = vadd.xlane.f32.xlu1 %v2356_v61 }
 0x163   : > { %949 = vadd.xlane.f32.xlu0 %v2360_v6  ;;  %v608_v6 = vld [vmem:[#allocation3] sm:$0xff] }
 0x164   : > { %569 = vadd.xlane.f32.xlu1 %v2368_v18 }
 0x167   : > { %663 = vadd.xlane.f32.xlu0 %v2363_v13  ;;  %v609_v13 = vld [vmem:[#allocation3 + $0x8] sm:$0xff] }
 0x168   : > { %952 = vadd.xlane.f32.xlu1 %v2370_v24 }
 0x16b   : > { %572 = vadd.xlane.f32.xlu0 %v2378_v36 }
 0x16c   : > { %666 = vadd.xlane.f32.xlu1 %v2373_v31 }
 0x16f   : > { %955 = vadd.xlane.f32.xlu0 %v2380_v42  ;;  %v537_v42 = vld [vmem:[#allocation2 + $0x10] sm:$0xff] }
 0x170   : > { %575 = vadd.xlane.f32.xlu1 %v574_v54 }
 0x173   : > { %669 = vadd.xlane.f32.xlu0 %v2383_v49 }
 0x174   : > { %958 = vadd.xlane.f32.xlu1 %v957_v60 }
 0x177   : > { %578 = vadd.xlane.f32.xlu0 %v577_v10 }
 0x178   : > { %672 = vadd.xlane.f32.xlu1 %v671_v3 }
 0x17b   : > { %961 = vadd.xlane.f32.xlu0 %v960_v21 }
 0x17c   : > { %581 = vadd.xlane.f32.xlu1 %v580_v29 }
 0x17f   : > { %675 = vadd.xlane.f32.xlu0 %v674_v25  ;;  %v612_v25 = vld [vmem:[#allocation3 + $0x20] sm:$0xff] }
 0x180   : > { %964 = vadd.xlane.f32.xlu1 %v963_v35 }
 0x183   : > { %1045 = vadd.xlane.f32.xlu0 %v2366_v17 }
 0x184   : > { %678 = vadd.xlane.f32.xlu1 %v677_v43 }
 0x187   : > { %1051 = vadd.xlane.f32.xlu0 %v2386_v53  ;;  %v538_v53 = vld [vmem:[#allocation2 + $0x18] sm:$0xff] }
 0x188   : > { %1048 = vadd.xlane.f32.xlu1 %v2376_v8 }
 0x18b   : > { %1057 = vadd.xlane.f32.xlu0 %v1056_v28 }
 0x18c   : > { %1054 = vadd.xlane.f32.xlu1 %v1053_v7 }
 0x190   : > { %1060 = vadd.xlane.f32.xlu1 %v1059_v39 }
 0x1bc   : > { %v549_v50 = vpop.xlane.xlu0 %548 }
 0x1bd   : > { %v583_v57 = vadd.f32 %v549_v50, %v535_v45  ;;  %v541_v50 = vld [vmem:[#allocation2 + $0x30] sm:$0xff] }
 0x1bf   : > { %596 = vst.msk [vmem:[#allocation2] sm:$0xff] %vm595_vm2, %v583_v57 }
 0x1c0   : > { %v932_v61 = vpop.xlane.xlu0 %931 }
 0x1c1   : > { %v935_v0 = vpop.xlane.xlu1 %934 }
 0x1c4   : > { %v646_v18 = vpop.xlane.xlu0 %645 }
 0x1c5   : > { %v680_v17 = vadd.f32 %v646_v18, %v608_v6  ;;  %v649_v24 = vpop.xlane.xlu1 %648 }
 0x1c6   : > { %v918_v31 = vld [vmem:[#allocation2] sm:$0xff]  ;;  %v681_v36 = vadd.f32 %v649_v24, %v609_v13  ;;  %v542_v24 = vld [vmem:[#allocation2 + $0x38] sm:$0xff] }
 0x1c7   : > { %v966_v14 = vadd.f32 %v932_v61, %v918_v31  ;;  %692 = vst.msk [vmem:[#allocation3] sm:$0xff] %vm595_vm2, %v680_v17 }
 0x1c8   : > { %693 = vst.msk [vmem:[#allocation3 + $0x8] sm:$0xff] %vm595_vm2, %v681_v36  ;;  %v1028_v8 = vpop.xlane.xlu0 %1027 }
 0x1c9   : > { %978 = vst.msk [vmem:[#allocation2] sm:$0xff] %vm595_vm2, %v966_v14  ;;  %v1031_v40 = vpop.xlane.xlu1 %1030 }
 0x1cc   : > { %v552_v44 = vpop.xlane.xlu0 %551 }
 0x1cd   : > { %v584_v26 = vadd.f32 %v552_v44, %v536_v41  ;;  %v555_v46 = vpop.xlane.xlu1 %554 }
 0x1ce   : > { %v990_v48 = vld [vmem:[#allocation3] sm:$0xff]  ;;  %v585_v49 = vadd.f32 %v555_v46, %v537_v42 }
 0x1cf   : > { %v1062_v51 = vadd.f32 %v1028_v8, %v990_v48  ;;  %v991_v52 = vld [vmem:[#allocation3 + $0x8] sm:$0xff]  ;;  %597 = vst.msk [vmem:[#allocation2 + $0x8] sm:$0xff] %vm595_vm2, %v584_v26  ;;  %v614_v8 = vld [vmem:[#allocation3 + $0x30] sm:$0xff]  ;;  %v543_v48 = vld [vmem:[#allocation2 + $0x40] sm:$0xff] }
 0x1d0   : > { %v1063_v54 = vadd.f32 %v1031_v40, %v991_v52  ;;  %598 = vst.msk [vmem:[#allocation2 + $0x10] sm:$0xff] %vm595_vm2, %v585_v49  ;;  %v938_v55 = vpop.xlane.xlu0 %937 }
 0x1d1   : > { %1074 = vst.msk [vmem:[#allocation3] sm:$0xff] %vm595_vm2, %v1062_v51  ;;  %v558_v56 = vpop.xlane.xlu1 %557  ;;  %v615_v51 = vld [vmem:[#allocation3 + $0x38] sm:$0xff] }
 0x1d2   : > { %1075 = vst.msk [vmem:[#allocation3 + $0x8] sm:$0xff] %vm595_vm2, %v1063_v54  ;;  %v586_v58 = vadd.f32 %v558_v56, %v538_v53 }
 0x1d4   : > { %599 = vst.msk [vmem:[#allocation2 + $0x18] sm:$0xff] %vm595_vm2, %v586_v58  ;;  %v652_v59 = vpop.xlane.xlu0 %651  ;;  %v544_v58 = vld [vmem:[#allocation2 + $0x48] sm:$0xff] }
 0x1d5   : > { %v682_v60 = vadd.f32 %v652_v59, %v610_v33  ;;  %v941_v62 = vpop.xlane.xlu1 %940 }
 0x1d6   : > { %v919_v63 = vld [vmem:[#allocation2 + $0x8] sm:$0xff] }
 0x1d7   : > { %v967_v30 = vadd.f32 %v935_v0, %v919_v63  ;;  %v920_v1 = vld [vmem:[#allocation2 + $0x10] sm:$0xff]  ;;  %694 = vst.msk [vmem:[#allocation3 + $0x10] sm:$0xff] %vm595_vm2, %v682_v60  ;;  %v616_v63 = vld [vmem:[#allocation3 + $0x40] sm:$0xff] }
 0x1d8   : > { %v968_v3 = vadd.f32 %v938_v55, %v920_v1  ;;  %v1034_v4 = vpop.xlane.xlu0 %1033 }
 0x1d9   : > { %979 = vst.msk [vmem:[#allocation2 + $0x8] sm:$0xff] %vm595_vm2, %v967_v30  ;;  %v655_v5 = vpop.xlane.xlu1 %654 }
 0x1da   : > { %980 = vst.msk [vmem:[#allocation2 + $0x10] sm:$0xff] %vm595_vm2, %v968_v3  ;;  %v683_v7 = vadd.f32 %v655_v5, %v611_v2 }
 0x1db   : > { %v921_v10 = vld [vmem:[#allocation2 + $0x18] sm:$0xff] }
 0x1dc   : > { %v969_v11 = vadd.f32 %v941_v62, %v921_v10  ;;  %695 = vst.msk [vmem:[#allocation3 + $0x18] sm:$0xff] %vm595_vm2, %v683_v7  ;;  %v561_v15 = vpop.xlane.xlu0 %560  ;;  %v617_v7 = vld [vmem:[#allocation3 + $0x48] sm:$0xff] }
 0x1dd   : > { %v1037_v16 = vpop.xlane.xlu1 %1036  ;;  %v587_v19 = vadd.f32 %v561_v15, %v539_v9 }
 0x1de   : > { %981 = vst.msk [vmem:[#allocation2 + $0x18] sm:$0xff] %vm595_vm2, %v969_v11  ;;  %v992_v38 = vld [vmem:[#allocation3 + $0x10] sm:$0xff] }
 0x1df   : > { %v1064_v21 = vadd.f32 %v1034_v4, %v992_v38  ;;  %600 = vst.msk [vmem:[#allocation2 + $0x20] sm:$0xff] %vm595_vm2, %v587_v19  ;;  %v545_v4 = vld [vmem:[#allocation2 + $0x50] sm:$0xff]  ;;  %v546_v19 = vld [vmem:[#allocation2 + $0x58] sm:$0xff] }
 0x1e0   : > { %v944_v12 = vpop.xlane.xlu0 %943 }
 0x1e1   : > { %1076 = vst.msk [vmem:[#allocation3 + $0x10] sm:$0xff] %vm595_vm2, %v1064_v21  ;;  %v564_v47 = vpop.xlane.xlu1 %563 }
 0x1e2   : > { %v588_v23 = vadd.f32 %v564_v47, %v540_v22  ;;  %v618_v47 = vld [vmem:[#allocation3 + $0x50] sm:$0xff] }
 0x1e3   : > { %v993_v27 = vld [vmem:[#allocation3 + $0x18] sm:$0xff] }
 0x1e4   : > { %v1065_v20 = vadd.f32 %v1037_v16, %v993_v27  ;;  %601 = vst.msk [vmem:[#allocation2 + $0x28] sm:$0xff] %vm595_vm2, %v588_v23  ;;  %v658_v28 = vpop.xlane.xlu0 %657 }
 0x1e5   : > { %v684_v29 = vadd.f32 %v658_v28, %v612_v25  ;;  %v947_v32 = vpop.xlane.xlu1 %946 }
 0x1e6   : > { %1077 = vst.msk [vmem:[#allocation3 + $0x18] sm:$0xff] %vm595_vm2, %v1065_v20  ;;  %v922_v34 = vld [vmem:[#allocation2 + $0x20] sm:$0xff] }
 0x1e7   : > { %v970_v35 = vadd.f32 %v944_v12, %v922_v34  ;;  %696 = vst.msk [vmem:[#allocation3 + $0x20] sm:$0xff] %vm595_vm2, %v684_v29  ;;  %v619_v29 = vld [vmem:[#allocation3 + $0x58] sm:$0xff] }
 0x1e8   : > { %v1040_v43 = vpop.xlane.xlu0 %1039 }
 0x1e9   : > { %982 = vst.msk [vmem:[#allocation2 + $0x20] sm:$0xff] %vm595_vm2, %v970_v35  ;;  %v661_v39 = vpop.xlane.xlu1 %660 }
 0x1ea   : > { %v685_v45 = vadd.f32 %v661_v39, %v613_v37 }
 0x1eb   : > { %v923_v57 = vld [vmem:[#allocation2 + $0x28] sm:$0xff] }
 0x1ec   : > { %v971_v61 = vadd.f32 %v947_v32, %v923_v57  ;;  %697 = vst.msk [vmem:[#allocation3 + $0x28] sm:$0xff] %vm595_vm2, %v685_v45  ;;  %v567_v0 = vpop.xlane.xlu0 %566 }
 0x1ed   : > { %v1043_v6 = vpop.xlane.xlu1 %1042  ;;  %v589_v13 = vadd.f32 %v567_v0, %v541_v50 }
 0x1ee   : > { %983 = vst.msk [vmem:[#allocation2 + $0x28] sm:$0xff] %vm595_vm2, %v971_v61  ;;  %v994_v18 = vld [vmem:[#allocation3 + $0x20] sm:$0xff] }
 0x1ef   : > { %v1066_v17 = vadd.f32 %v1040_v43, %v994_v18  ;;  %602 = vst.msk [vmem:[#allocation2 + $0x30] sm:$0xff] %vm595_vm2, %v589_v13 }
 0x1f0   : > { %v950_v31 = vpop.xlane.xlu0 %949 }
 0x1f1   : > { %1078 = vst.msk [vmem:[#allocation3 + $0x20] sm:$0xff] %vm595_vm2, %v1066_v17  ;;  %v570_v36 = vpop.xlane.xlu1 %569 }
 0x1f2   : > { %v590_v14 = vadd.f32 %v570_v36, %v542_v24 }
 0x1f3   : > { %v995_v40 = vld [vmem:[#allocation3 + $0x28] sm:$0xff] }
 0x1f4   : > { %v1067_v41 = vadd.f32 %v1043_v6, %v995_v40  ;;  %603 = vst.msk [vmem:[#allocation2 + $0x38] sm:$0xff] %vm595_vm2, %v590_v14  ;;  %v664_v42 = vpop.xlane.xlu0 %663 }
 0x1f5   : > { %v686_v44 = vadd.f32 %v664_v42, %v614_v8  ;;  %v953_v26 = vpop.xlane.xlu1 %952 }
 0x1f6   : > { %1079 = vst.msk [vmem:[#allocation3 + $0x28] sm:$0xff] %vm595_vm2, %v1067_v41  ;;  %v924_v46 = vld [vmem:[#allocation2 + $0x30] sm:$0xff] }
 0x1f7   : > { %v972_v49 = vadd.f32 %v950_v31, %v924_v46  ;;  %698 = vst.msk [vmem:[#allocation3 + $0x30] sm:$0xff] %vm595_vm2, %v686_v44 }
 0x1f8   : > { %v573_v52 = vpop.xlane.xlu0 %572 }
 0x1f9   : > { %984 = vst.msk [vmem:[#allocation2 + $0x30] sm:$0xff] %vm595_vm2, %v972_v49  ;;  %v667_v53 = vpop.xlane.xlu1 %666  ;;  %v591_v54 = vadd.f32 %v573_v52, %v543_v48 }
 0x1fa   : > { %v687_v55 = vadd.f32 %v667_v53, %v615_v51 }
 0x1fb   : > { %v925_v56 = vld [vmem:[#allocation2 + $0x38] sm:$0xff]  ;;  %604 = vst.msk [vmem:[#allocation2 + $0x40] sm:$0xff] %vm595_vm2, %v591_v54 }
 0x1fc   : > { %v973_v33 = vadd.f32 %v953_v26, %v925_v56  ;;  %699 = vst.msk [vmem:[#allocation3 + $0x38] sm:$0xff] %vm595_vm2, %v687_v55  ;;  %v956_v59 = vpop.xlane.xlu0 %955 }
 0x1fd   : > { %v576_v60 = vpop.xlane.xlu1 %575 }
 0x1fe   : > { %985 = vst.msk [vmem:[#allocation2 + $0x38] sm:$0xff] %vm595_vm2, %v973_v33  ;;  %v592_v62 = vadd.f32 %v576_v60, %v544_v58  ;;  %v996_v32 = vld [vmem:[#allocation3 + $0x30] sm:$0xff] }
 0x200   : > { %605 = vst.msk [vmem:[#allocation2 + $0x48] sm:$0xff] %vm595_vm2, %v592_v62  ;;  %v670_v30 = vpop.xlane.xlu0 %669 }
 0x201   : > { %v688_v1 = vadd.f32 %v670_v30, %v616_v63  ;;  %v959_v2 = vpop.xlane.xlu1 %958 }
 0x202   : > { %v926_v3 = vld [vmem:[#allocation2 + $0x40] sm:$0xff] }
 0x203   : > { %v974_v5 = vadd.f32 %v956_v59, %v926_v3  ;;  %700 = vst.msk [vmem:[#allocation3 + $0x40] sm:$0xff] %vm595_vm2, %v688_v1  ;;  %v997_v0 = vld [vmem:[#allocation3 + $0x38] sm:$0xff] }
 0x204   : > { %v579_v9 = vpop.xlane.xlu0 %578 }
 0x205   : > { %986 = vst.msk [vmem:[#allocation2 + $0x40] sm:$0xff] %vm595_vm2, %v974_v5  ;;  %v673_v10 = vpop.xlane.xlu1 %672  ;;  %v593_v11 = vadd.f32 %v579_v9, %v545_v4 }
 0x206   : > { %v689_v15 = vadd.f32 %v673_v10, %v617_v7 }
 0x207   : > { %v927_v16 = vld [vmem:[#allocation2 + $0x48] sm:$0xff]  ;;  %606 = vst.msk [vmem:[#allocation2 + $0x50] sm:$0xff] %vm595_vm2, %v593_v11 }
 0x208   : > { %v975_v38 = vadd.f32 %v959_v2, %v927_v16  ;;  %701 = vst.msk [vmem:[#allocation3 + $0x48] sm:$0xff] %vm595_vm2, %v689_v15  ;;  %v962_v21 = vpop.xlane.xlu0 %961 }
 0x209   : > { %v582_v22 = vpop.xlane.xlu1 %581 }
 0x20a   : > { %987 = vst.msk [vmem:[#allocation2 + $0x48] sm:$0xff] %vm595_vm2, %v975_v38  ;;  %v594_v12 = vadd.f32 %v582_v22, %v546_v19  ;;  %v998_v50 = vld [vmem:[#allocation3 + $0x40] sm:$0xff] }
 0x20c   : > { %607 = vst.msk [vmem:[#allocation2 + $0x58] sm:$0xff] %vm595_vm2, %v594_v12  ;;  %v676_v23 = vpop.xlane.xlu0 %675 }
 0x20d   : > { %v690_v25 = vadd.f32 %v676_v23, %v618_v47  ;;  %v965_v27 = vpop.xlane.xlu1 %964 }
 0x20e   : > { %v928_v20 = vld [vmem:[#allocation2 + $0x50] sm:$0xff] }
 0x20f   : > { %v976_v28 = vadd.f32 %v962_v21, %v928_v20  ;;  %702 = vst.msk [vmem:[#allocation3 + $0x50] sm:$0xff] %vm595_vm2, %v690_v25  ;;  %v999_v31 = vld [vmem:[#allocation3 + $0x48] sm:$0xff] }
 0x210   : > { %v1046_v34 = vpop.xlane.xlu0 %1045 }
 0x211   : > { %988 = vst.msk [vmem:[#allocation2 + $0x50] sm:$0xff] %vm595_vm2, %v976_v28  ;;  %v1068_v35 = vadd.f32 %v1046_v34, %v996_v32  ;;  %v679_v37 = vpop.xlane.xlu1 %678 }
 0x212   : > { %v691_v43 = vadd.f32 %v679_v37, %v619_v29 }
 0x213   : > { %v929_v39 = vld [vmem:[#allocation2 + $0x58] sm:$0xff]  ;;  %1080 = vst.msk [vmem:[#allocation3 + $0x30] sm:$0xff] %vm595_vm2, %v1068_v35 }
 0x214   : > { %v977_v45 = vadd.f32 %v965_v27, %v929_v39  ;;  %703 = vst.msk [vmem:[#allocation3 + $0x58] sm:$0xff] %vm595_vm2, %v691_v43  ;;  %v1052_v57 = vpop.xlane.xlu0 %1051 }
 0x215   : > { %v1070_v61 = vadd.f32 %v1052_v57, %v998_v50  ;;  %v1049_v6 = vpop.xlane.xlu1 %1048 }
 0x216   : > { %989 = vst.msk [vmem:[#allocation2 + $0x58] sm:$0xff] %vm595_vm2, %v977_v45  ;;  %v1069_v13 = vadd.f32 %v1049_v6, %v997_v0  ;;  %v1000_v18 = vld [vmem:[#allocation3 + $0x50] sm:$0xff] }
 0x217   : > { %1082 = vst.msk [vmem:[#allocation3 + $0x40] sm:$0xff] %vm595_vm2, %v1070_v61 }
 0x218   : > { %1081 = vst.msk [vmem:[#allocation3 + $0x38] sm:$0xff] %vm595_vm2, %v1069_v13  ;;  %v1058_v17 = vpop.xlane.xlu0 %1057 }
 0x219   : > { %v1072_v24 = vadd.f32 %v1058_v17, %v1000_v18  ;;  %v1055_v36 = vpop.xlane.xlu1 %1054 }
 0x21a   : > { %v1071_v14 = vadd.f32 %v1055_v36, %v999_v31 }
 0x21b   : > { %1084 = vst.msk [vmem:[#allocation3 + $0x50] sm:$0xff] %vm595_vm2, %v1072_v24  ;;  %v1001_v8 = vld [vmem:[#allocation3 + $0x58] sm:$0xff] }
 0x21c   : > { %1083 = vst.msk [vmem:[#allocation3 + $0x48] sm:$0xff] %vm595_vm2, %v1071_v14 }
 0x21d   : > { %v1061_v40 = vpop.xlane.xlu1 %1060 }
 0x21e   : > { %v1073_v41 = vadd.f32 %v1061_v40, %v1001_v8 }
 0x220   : > { %1085 = vst.msk [vmem:[#allocation3 + $0x58] sm:$0xff] %vm595_vm2, %v1073_v41 }
 0x221 PF: > { %p1114_p5 = scmp.eq.s32.totalorder %s2123_s15, 1 }
 0x222   : > { %v1119_v42 = vld [vmem:[#allocation2] sm:$0xff] (%p1114_p5)  ;;  %v1120_v48 = vld [vmem:[#allocation2 + $0x8] sm:$0xff] (%p1114_p5)  ;;  %v1121_v53 = vld [vmem:[#allocation2 + $0x10] sm:$0xff] (%p1114_p5)  ;;  %vm1251_vm3 = vcmask (%p1114_p5), 7168  }
 0x223   : > { %1118 = sbr.rel (!%p1114_p5) target bundleno = 590 (0x24e), region = 52  ;;  %v1143_v44 = vld [vmem:[#allocation3] sm:$0xff] (%p1114_p5)  ;;  %v2456_v26 = vmul.f32 (%p1114_p5), 0.001953125, %v1119_v42  ;;  %v1144_v49 = vld [vmem:[#allocation3 + $0x8] sm:$0xff] (%p1114_p5)  ;;  %v2458_v51 = vmul.f32 (%p1114_p5), 0.001953125, %v1120_v48  ;;  %v1145_v54 = vld [vmem:[#allocation3 + $0x10] sm:$0xff] (%p1114_p5) }
 0x224   : > { %v1155_v46 = vmul.f32 (%p1114_p5), 0.001953125, %v1143_v44  ;;  %v1156_v52 = vmul.f32 (%p1114_p5), 0.001953125, %v1144_v49  ;;  %v2462_v56 = vmul.f32 (%p1114_p5), 0.001953125, %v1121_v53  ;;  %v1157_v58 = vmul.f32 (%p1114_p5), 0.001953125, %v1145_v54  ;;  %v1122_v33 = vld [vmem:[#allocation2 + $0x18] sm:$0xff] (%p1114_p5)  ;;  %v1123_v30 = vld [vmem:[#allocation2 + $0x20] sm:$0xff] (%p1114_p5) }
 0x225   : > { %v1167_v55 = vmul.f32 (%p1114_p5), %v2456_v26, %v2456_v26  ;;  %v1146_v59 = vld [vmem:[#allocation3 + $0x18] sm:$0xff] (%p1114_p5)  ;;  %v1168_v60 = vmul.f32 (%p1114_p5), %v2458_v51, %v2458_v51  ;;  %v2466_v62 = vmul.f32 (%p1114_p5), 0.001953125, %v1122_v33  ;;  %v1147_v1 = vld [vmem:[#allocation3 + $0x20] sm:$0xff] (%p1114_p5)  ;;  %v2470_v4 = vmul.f32 (%p1114_p5), 0.001953125, %v1123_v30  ;;  %v1124_v7 = vld [vmem:[#allocation2 + $0x28] sm:$0xff] (%p1114_p5) }
 0x226   : > { %v1158_v63 = vmul.f32 (%p1114_p5), 0.001953125, %v1146_v59  ;;  %v1169_v3 = vmul.f32 (%p1114_p5), %v2462_v56, %v2462_v56  ;;  %v1159_v5 = vmul.f32 (%p1114_p5), 0.001953125, %v1147_v1  ;;  %v1148_v9 = vld [vmem:[#allocation3 + $0x28] sm:$0xff] (%p1114_p5)  ;;  %v2474_v15 = vmul.f32 (%p1114_p5), 0.001953125, %v1124_v7  ;;  %v1125_v19 = vld [vmem:[#allocation2 + $0x30] sm:$0xff] (%p1114_p5)  ;;  %v1126_v23 = vld [vmem:[#allocation2 + $0x38] sm:$0xff] (%p1114_p5) }
 0x227   : > { %v1179_v2 = vsub.f32 (%p1114_p5), %v1155_v46, %v1167_v55  ;;  %v1180_v10 = vsub.f32 (%p1114_p5), %v1156_v52, %v1168_v60  ;;  %v1170_v11 = vmul.f32 (%p1114_p5), %v2466_v62, %v2466_v62  ;;  %v1160_v16 = vmul.f32 (%p1114_p5), 0.001953125, %v1148_v9  ;;  %v1149_v38 = vld [vmem:[#allocation3 + $0x30] sm:$0xff] (%p1114_p5)  ;;  %v1150_v37 = vld [vmem:[#allocation3 + $0x38] sm:$0xff] (%p1114_p5)  ;;  %v1127_v6 = vld [vmem:[#allocation2 + $0x40] sm:$0xff] (%p1114_p5) }
 0x228   : > { %v1181_v22 = vsub.f32 (%p1114_p5), %v1157_v58, %v1169_v3  ;;  %v1171_v12 = vmul.f32 (%p1114_p5), %v2470_v4, %v2470_v4  ;;  %v2478_v47 = vmul.f32 (%p1114_p5), 0.001953125, %v1125_v19  ;;  %v1172_v20 = vmul.f32 (%p1114_p5), %v2474_v15, %v2474_v15  ;;  %v1151_v13 = vld [vmem:[#allocation3 + $0x40] sm:$0xff] (%p1114_p5)  ;;  %v1128_v31 = vld [vmem:[#allocation2 + $0x48] sm:$0xff] (%p1114_p5)  ;;  %v1129_v41 = vld [vmem:[#allocation2 + $0x50] sm:$0xff] (%p1114_p5) }
 0x229   : > { %v1191_v21 = vmax.f32 (%p1114_p5), %v1179_v2, 0.0  ;;  %v1192_v25 = vmax.f32 (%p1114_p5), %v1180_v10, 0.0  ;;  %v1182_v27 = vsub.f32 (%p1114_p5), %v1158_v63, %v1170_v11  ;;  %v1161_v28 = vmul.f32 (%p1114_p5), 0.001953125, %v1149_v38  ;;  %v1152_v40 = vld [vmem:[#allocation3 + $0x48] sm:$0xff] (%p1114_p5)  ;;  %v1153_v48 = vld [vmem:[#allocation3 + $0x50] sm:$0xff] (%p1114_p5)  ;;  %v1130_v54 = vld [vmem:[#allocation2 + $0x58] sm:$0xff] (%p1114_p5) }
 0x22a   : > { %v1193_v32 = vmax.f32 %v1181_v22, 0.0  ;;  %v1183_v34 = vsub.f32 %v1159_v5, %v1171_v12  ;;  %v1173_v35 = vmul.f32 %v2478_v47, %v2478_v47  ;;  %v1184_v45 = vsub.f32 %v1160_v16, %v1172_v20  ;;  %v1154_v55 = vld [vmem:[#allocation3 + $0x58] sm:$0xff]  ;;  %v1203_v7 = vld [vmem:[%s2700_s2] sm:$0xff]  ;;  %v1204_v11 = vld [vmem:[%s2700_s2 + $0x8] sm:$0xff] }
 0x22b   : > { %v1215_v29 = vadd.f32 1e-05, %v1191_v21  ;;  %v1216_v43 = vadd.f32 1e-05, %v1192_v25  ;;  %v1194_v39 = vmax.f32 %v1182_v27, 0.0  ;;  %v2484_v50 = vmul.f32 0.001953125, %v1126_v23 }
 0x22c   : > { %v1217_v57 = vadd.f32 1e-05, %v1193_v32  ;;  %v1195_v61 = vmax.f32 %v1183_v34, 0.0  ;;  %v1185_v0 = vsub.f32 %v1161_v28, %v1173_v35  ;;  %v1196_v17 = vmax.f32 %v1184_v45, 0.0  ;;  %v1205_v22 = vld [vmem:[%s2700_s2 + $0x10] sm:$0xff]  ;;  %v1206_v27 = vld [vmem:[%s2700_s2 + $0x18] sm:$0xff] }
 0x22d   : > { %2021 = vrsqrt.f32 %v1215_v29  ;;  %v1218_v18 = vadd.f32 1e-05, %v1194_v39  ;;  %v1162_v24 = vmul.f32 0.001953125, %v1150_v37  ;;  %v1174_v8 = vmul.f32 %v2484_v50, %v2484_v50  ;;  %v1207_v35 = vld [vmem:[%s2700_s2 + $0x20] sm:$0xff]  ;;  %v1208_v45 = vld [vmem:[%s2700_s2 + $0x28] sm:$0xff] }
 0x22e   : > { %2023 = vrsqrt.f32 %v1216_v43  ;;  %v1219_v36 = vadd.f32 1e-05, %v1195_v61  ;;  %v1197_v14 = vmax.f32 %v1185_v0, 0.0  ;;  %v1220_v42 = vadd.f32 1e-05, %v1196_v17  ;;  %v1264_v0 = vld [vmem:[%s2701_s3] sm:$0xff] }
 0x22f   : > { %2025 = vrsqrt.f32 %v1217_v57  ;;  %v2488_v44 = vmul.f32 0.001953125, %v1127_v6  ;;  %v1163_v46 = vmul.f32 0.001953125, %v1151_v13  ;;  %v1186_v52 = vsub.f32 %v1162_v24, %v1174_v8  ;;  %v1265_v6 = vld [vmem:[%s2701_s3 + $0x8] sm:$0xff]  ;;  %v1209_v17 = vld [vmem:[%s2700_s2 + $0x30] sm:$0xff] }
 0x230   : > { %2027 = vrsqrt.f32 %v1218_v18  ;;  %v1221_v49 = vadd.f32 1e-05, %v1197_v14  ;;  %v2490_v53 = vmul.f32 0.001953125, %v1128_v31  ;;  %v1164_v33 = vmul.f32 0.001953125, %v1152_v40 }
 0x231   : > { %2029 = vrsqrt.f32 %v1219_v36  ;;  %v1175_v58 = vmul.f32 %v2488_v44, %v2488_v44  ;;  %v2494_v59 = vmul.f32 0.001953125, %v1129_v41  ;;  %v1198_v60 = vmax.f32 %v1186_v52, 0.0  ;;  %v1266_v36 = vld [vmem:[%s2701_s3 + $0x10] sm:$0xff]  ;;  %v1268_v52 = vld [vmem:[%s2701_s3 + $0x20] sm:$0xff] }
 0x232   : > { %2031 = vrsqrt.f32 %v1220_v42  ;;  %v1176_v63 = vmul.f32 %v2490_v53, %v2490_v53  ;;  %v1165_v30 = vmul.f32 0.001953125, %v1153_v48  ;;  %v2500_v3 = vmul.f32 0.001953125, %v1130_v54  ;;  %v1267_v42 = vld [vmem:[%s2701_s3 + $0x18] sm:$0xff] }
 0x233   : > { %2033 = vrsqrt.f32 %v1221_v49  ;;  %v1187_v1 = vsub.f32 %v1163_v46, %v1175_v58  ;;  %v1177_v2 = vmul.f32 %v2494_v59, %v2494_v59  ;;  %v1166_v5 = vmul.f32 0.001953125, %v1154_v55  ;;  %v1269_v58 = vld [vmem:[%s2701_s3 + $0x28] sm:$0xff] }
 0x234   : > { %v1222_v9 = vadd.f32 1e-05, %v1198_v60  ;;  %v1188_v10 = vsub.f32 %v1164_v33, %v1176_v63  ;;  %v1178_v38 = vmul.f32 %v2500_v3, %v2500_v3 }
 0x235   : > { %v1199_v16 = vmax.f32 %v1187_v1, 0.0  ;;  %v1189_v19 = vsub.f32 %v1165_v30, %v1177_v2 }
 0x236   : > { %2035 = vrsqrt.f32 %v1222_v9  ;;  %v1200_v12 = vmax.f32 %v1188_v10, 0.0  ;;  %v1190_v29 = vsub.f32 %v1166_v5, %v1178_v38  ;;  %v1212_v9 = vld [vmem:[%s2700_s2 + $0x48] sm:$0xff] }
 0x237   : > { %v2022_v21 = vpop.eup %2021  ;;  %v1223_v20 = vadd.f32 1e-05, %v1199_v16  ;;  %v1201_v28 = vmax.f32 %v1189_v19, 0.0 }
 0x238   : > { %v2024_v23 = vpop.eup %2023  ;;  %v1239_v25 = vmul.f32 %v2022_v21, %v1203_v7  ;;  %v1224_v37 = vadd.f32 1e-05, %v1200_v12  ;;  %v1202_v61 = vmax.f32 %v1190_v29, 0.0  ;;  %v1214_v12 = vld [vmem:[%s2700_s2 + $0x58] sm:$0xff] }
 0x239   : > { %v2026_v32 = vpop.eup %2025  ;;  %v1240_v34 = vmul.f32 %v2024_v23, %v1204_v11  ;;  %2037 = vrsqrt.f32 %v1223_v20  ;;  %v1225_v57 = vadd.f32 1e-05, %v1201_v28  ;;  %v1213_v11 = vld [vmem:[%s2700_s2 + $0x50] sm:$0xff] }
 0x23a   : > { %v2028_v43 = vpop.eup %2027  ;;  %1252 = vst.msk [vmem:[#allocation4] sm:$0xff] %vm1251_vm3, %v1239_v25  ;;  %v1241_v39 = vmul.f32 %v2026_v32, %v1205_v22  ;;  %2039 = vrsqrt.f32 %v1224_v37  ;;  %v1276_v24 = vmul.f32 %v1239_v25, %v2456_v26  ;;  %v1226_v40 = vadd.f32 1e-05, %v1202_v61  ;;  %v1272_v25 = vld [vmem:[%s2701_s3 + $0x40] sm:$0xff]  ;;  %v1274_v32 = vld [vmem:[%s2701_s3 + $0x50] sm:$0xff] }
 0x23b   : > { %v2030_v13 = vpop.eup %2029  ;;  %1253 = vst.msk [vmem:[#allocation4 + $0x8] sm:$0xff] %vm1251_vm3, %v1240_v34  ;;  %v1242_v18 = vmul.f32 %v2028_v43, %v1206_v27  ;;  %v1277_v31 = vmul.f32 %v1240_v34, %v2458_v51  ;;  %2041 = vrsqrt.f32 %v1225_v57  ;;  %v1275_v43 = vld [vmem:[%s2701_s3 + $0x58] sm:$0xff] }
 0x23c   : > { %v2032_v14 = vpop.eup %2031  ;;  %1254 = vst.msk [vmem:[#allocation4 + $0x10] sm:$0xff] %vm1251_vm3, %v1241_v39  ;;  %v1243_v8 = vmul.f32 %v2030_v13, %v1207_v35  ;;  %v1278_v41 = vmul.f32 %v1241_v39, %v2462_v56  ;;  %v1288_v51 = vsub.f32 %v1264_v0, %v1276_v24  ;;  %2043 = vrsqrt.f32 %v1226_v40 }
 0x23d   : > { %v2034_v46 = vpop.eup %2033  ;;  %1255 = vst.msk [vmem:[#allocation4 + $0x18] sm:$0xff] %vm1251_vm3, %v1242_v18  ;;  %v1244_v26 = vmul.f32 %v2032_v14, %v1208_v45  ;;  %v1289_v48 = vsub.f32 %v1265_v6, %v1277_v31  ;;  %v1279_v49 = vmul.f32 %v1242_v18, %v2466_v62  ;;  %v1210_v62 = vld [vmem:[%s2700_s2 + $0x38] sm:$0xff] }
 0x23e   : > { %1256 = vst.msk [vmem:[#allocation4 + $0x20] sm:$0xff] %vm1251_vm3, %v1243_v8  ;;  %v1245_v54 = vmul.f32 %v2034_v46, %v1209_v17  ;;  %v1290_v56 = vsub.f32 %v1266_v36, %v1278_v41  ;;  %v1280_v55 = vmul.f32 %v1243_v8, %v2470_v4  ;;  %1300 = vst.msk [vmem:[#allocation5] sm:$0xff] %vm1251_vm3, %v1288_v51  ;;  %v1270_v4 = vld [vmem:[%s2701_s3 + $0x30] sm:$0xff] }
 0x23f   : > { %1257 = vst.msk [vmem:[#allocation4 + $0x28] sm:$0xff] %vm1251_vm3, %v1244_v26  ;;  %1301 = vst.msk [vmem:[#allocation5 + $0x8] sm:$0xff] %vm1251_vm3, %v1289_v48  ;;  %v1291_v33 = vsub.f32 %v1267_v42, %v1279_v49  ;;  %v1281_v60 = vmul.f32 %v1244_v26, %v2474_v15  ;;  %v1211_v15 = vld [vmem:[%s2700_s2 + $0x40] sm:$0xff] }
 0x240   : > { %1258 = vst.msk [vmem:[#allocation4 + $0x30] sm:$0xff] %vm1251_vm3, %v1245_v54  ;;  %1302 = vst.msk [vmem:[#allocation5 + $0x10] sm:$0xff] %vm1251_vm3, %v1290_v56  ;;  %v1292_v63 = vsub.f32 %v1268_v52, %v1280_v55  ;;  %v1282_v30 = vmul.f32 %v1245_v54, %v2478_v47  ;;  %v2036_v1 = vpop.eup %2035  ;;  %v1271_v47 = vld [vmem:[%s2701_s3 + $0x38] sm:$0xff] }
 0x241   : > { %1303 = vst.msk [vmem:[#allocation5 + $0x18] sm:$0xff] %vm1251_vm3, %v1291_v33  ;;  %v1293_v2 = vsub.f32 %v1269_v58, %v1281_v60  ;;  %v1246_v5 = vmul.f32 %v2036_v1, %v1210_v62 }
 0x242   : > { %1304 = vst.msk [vmem:[#allocation5 + $0x20] sm:$0xff] %vm1251_vm3, %v1292_v63  ;;  %v1294_v7 = vsub.f32 %v1270_v4, %v1282_v30 }
 0x243   : > { %1305 = vst.msk [vmem:[#allocation5 + $0x28] sm:$0xff] %vm1251_vm3, %v1293_v2  ;;  %v2038_v10 = vpop.eup %2037  ;;  %1259 = vst.msk [vmem:[#allocation4 + $0x38] sm:$0xff] %vm1251_vm3, %v1246_v5  ;;  %v1283_v16 = vmul.f32 %v1246_v5, %v2484_v50  ;;  %v1273_v50 = vld [vmem:[%s2701_s3 + $0x48] sm:$0xff] }
 0x244   : > { %1306 = vst.msk [vmem:[#allocation5 + $0x30] sm:$0xff] %vm1251_vm3, %v1294_v7  ;;  %v2040_v19 = vpop.eup %2039  ;;  %v1247_v38 = vmul.f32 %v2038_v10, %v1211_v15 }
 0x245   : > { %v2042_v21 = vpop.eup %2041  ;;  %v1248_v22 = vmul.f32 %v2040_v19, %v1212_v9  ;;  %v1295_v23 = vsub.f32 %v1271_v47, %v1283_v16 }
 0x246   : > { %1260 = vst.msk [vmem:[#allocation4 + $0x40] sm:$0xff] %vm1251_vm3, %v1247_v38  ;;  %v1249_v27 = vmul.f32 %v2042_v21, %v1213_v11  ;;  %v1284_v20 = vmul.f32 %v1247_v38, %v2488_v44  ;;  %v2044_v28 = vpop.eup %2043 }
 0x247   : > { %1261 = vst.msk [vmem:[#allocation4 + $0x48] sm:$0xff] %vm1251_vm3, %v1248_v22  ;;  %1307 = vst.msk [vmem:[#allocation5 + $0x38] sm:$0xff] %vm1251_vm3, %v1295_v23  ;;  %v1285_v29 = vmul.f32 %v1248_v22, %v2490_v53  ;;  %v1250_v34 = vmul.f32 %v2044_v28, %v1214_v12 }
 0x248   : > { %1262 = vst.msk [vmem:[#allocation4 + $0x50] sm:$0xff] %vm1251_vm3, %v1249_v27  ;;  %v1296_v35 = vsub.f32 %v1272_v25, %v1284_v20  ;;  %v1286_v44 = vmul.f32 %v1249_v27, %v2494_v59 }
 0x249   : > { %v1297_v37 = vsub.f32 %v1273_v50, %v1285_v29  ;;  %1263 = vst.msk [vmem:[#allocation4 + $0x58] sm:$0xff] %vm1251_vm3, %v1250_v34  ;;  %v1287_v39 = vmul.f32 %v1250_v34, %v2500_v3 }
 0x24a   : > { %1308 = vst.msk [vmem:[#allocation5 + $0x40] sm:$0xff] %vm1251_vm3, %v1296_v35  ;;  %v1298_v53 = vsub.f32 %v1274_v32, %v1286_v44 }
 0x24b   : > { %1309 = vst.msk [vmem:[#allocation5 + $0x48] sm:$0xff] %vm1251_vm3, %v1297_v37  ;;  %v1299_v45 = vsub.f32 %v1275_v43, %v1287_v39 }
 0x24c   : > { %1310 = vst.msk [vmem:[#allocation5 + $0x50] sm:$0xff] %vm1251_vm3, %v1298_v53 }
 0x24d   : > { %1311 = vst.msk [vmem:[#allocation5 + $0x58] sm:$0xff] %vm1251_vm3, %v1299_v45 }
 0x24e PF: > { %p1863_p10 = scmp.ne.s32.totalorder %s2123_s15, 1 }
 0x24f   : > { %v1317_v59 = vld [vmem:[#allocation4 + $0x10] sm:$0xff] (!%p1863_p10)  ;;  %v1315_v57 = vld [vmem:[#allocation4] sm:$0xff] (!%p1863_p10)  ;;  %v2138_v61 = vmov (!%p1863_p10), 0   ;;  %v1318_v0 = vld [vmem:[#allocation4 + $0x18] sm:$0xff] (!%p1863_p10) }
 0x250   : > { %1314 = sbr.rel (%p1863_p10) target bundleno = 773 (0x305), region = 56  ;;  %2046 = vset.pattern.permute.xlu1 (!%p1863_p10), %v2138_v61  ;;  %2045 = vset.pattern.permute.xlu0 (!%p1863_p10), %v2138_v61  ;;  %v1316_v3 = vld [vmem:[#allocation4 + $0x8] sm:$0xff] (!%p1863_p10)  ;;  %v1319_v13 = vld [vmem:[#allocation4 + $0x20] sm:$0xff] (!%p1863_p10)  ;;  %v1322_v18 = vld [vmem:[#allocation4 + $0x38] sm:$0xff] (!%p1863_p10) }
 0x251   : > { %1379 = vperm.xlu1 (!%p1863_p10), %2046, %v1317_v59   ;;  %1369 = vperm.xlu0 (!%p1863_p10), %2045, %v1315_v57   ;;  %v1320_v6 = vld [vmem:[#allocation4 + $0x28] sm:$0xff] (!%p1863_p10)  ;;  %v1321_v17 = vld [vmem:[#allocation4 + $0x30] sm:$0xff] (!%p1863_p10)  ;;  %v1323_v31 = vld [vmem:[#allocation4 + $0x40] sm:$0xff] (!%p1863_p10) }
 0x252   : > { %v1324_v24 = vld [vmem:[#allocation4 + $0x48] sm:$0xff] (!%p1863_p10)  ;;  %v1326_v36 = vld [vmem:[#allocation4 + $0x58] sm:$0xff] (!%p1863_p10)  ;;  %v1325_v14 = vld [vmem:[#allocation4 + $0x50] sm:$0xff] (!%p1863_p10) }
 0x253   : > { %v1328_v8 = vld [vmem:[#allocation5 + $0x8] sm:$0xff] (!%p1863_p10)  ;;  %v1327_v40 = vld [vmem:[#allocation5] sm:$0xff] (!%p1863_p10)  ;;  %v1330_v41 = vld [vmem:[#allocation5 + $0x18] sm:$0xff] (!%p1863_p10) }
 0x254   : > { %v1329_v42 = vld [vmem:[#allocation5 + $0x10] sm:$0xff] (!%p1863_p10)  ;;  %v1332_v46 = vld [vmem:[#allocation5 + $0x28] sm:$0xff] (!%p1863_p10)  ;;  %v1331_v26 = vld [vmem:[#allocation5 + $0x20] sm:$0xff] (!%p1863_p10) }
 0x255   : > { %1384 = vperm.xlu1 (!%p1863_p10), %2046, %v1318_v0   ;;  %1374 = vperm.xlu0 (!%p1863_p10), %2045, %v1316_v3   ;;  %v1334_v51 = vld [vmem:[#allocation5 + $0x38] sm:$0xff] (!%p1863_p10)  ;;  %v1333_v48 = vld [vmem:[#allocation5 + $0x30] sm:$0xff] (!%p1863_p10)  ;;  %v1336_v49 = vld [vmem:[#allocation5 + $0x48] sm:$0xff] (!%p1863_p10) }
 0x256   : > { %v1335_v52 = vld [vmem:[#allocation5 + $0x40] sm:$0xff] (!%p1863_p10)  ;;  %v1338_v54 = vld [vmem:[#allocation5 + $0x58] sm:$0xff] (!%p1863_p10)  ;;  %v1337_v56 = vld [vmem:[#allocation5 + $0x50] sm:$0xff] (!%p1863_p10) }
 0x257   : > { %v1343_v5 = vld [vmem:[#allocation6] sm:$0xff]  ;;  %v1345_v15 = vld [vmem:[#allocation6 + $0x10] sm:$0xff]  ;;  %v1346_v7 = vld [vmem:[#allocation6 + $0x18] sm:$0xff] }
 0x258   : > { %v1866_v9 = vld [vmem:[#allocation6 + $0xd0] sm:$0xff]  ;;  %v1867_v47 = vld [vmem:[#allocation6 + $0xd8] sm:$0xff]  ;;  %v1344_v16 = vld [vmem:[#allocation6 + $0x8] sm:$0xff] }
 0x259   : > { %1394 = vperm.xlu1 %2046, %v1320_v6   ;;  %1389 = vperm.xlu0 %2045, %v1319_v13   ;;  %v1864_v19 = vld [vmem:[#allocation6 + $0xc0] sm:$0xff]  ;;  %v1865_v38 = vld [vmem:[#allocation6 + $0xc8] sm:$0xff]  ;;  %v1349_v22 = vld [vmem:[#allocation6 + $0x30] sm:$0xff] }
 0x25a   : > { %v1347_v21 = vld [vmem:[#allocation6 + $0x20] sm:$0xff]  ;;  %v1350_v32 = vld [vmem:[#allocation6 + $0x38] sm:$0xff]  ;;  %v1870_v34 = vld [vmem:[#allocation6 + $0xf0] sm:$0xff] }
 0x25b   : > { %v1871_v35 = vld [vmem:[#allocation6 + $0xf8] sm:$0xff]  ;;  %v1348_v43 = vld [vmem:[#allocation6 + $0x28] sm:$0xff]  ;;  %v1868_v53 = vld [vmem:[#allocation6 + $0xe0] sm:$0xff] }
 0x25c   : > { %v1869_v39 = vld [vmem:[#allocation6 + $0xe8] sm:$0xff] }
 0x25d   : > { %1404 = vperm.xlu1 %2046, %v1322_v18   ;;  %1399 = vperm.xlu0 %2045, %v1321_v17  }
 0x261   : > { %1414 = vperm.xlu1 %2046, %v1324_v24   ;;  %1409 = vperm.xlu0 %2045, %v1323_v31  }
 0x265   : > { %1424 = vperm.xlu1 %2046, %v1326_v36   ;;  %1419 = vperm.xlu0 %2045, %v1325_v14   ;;  %v1353_v36 = vld [vmem:[#allocation6 + $0x50] sm:$0xff]  ;;  %v1354_v14 = vld [vmem:[#allocation6 + $0x58] sm:$0xff] }
 0x269   : > { %1458 = vperm.xlu1 %2046, %v1328_v8   ;;  %1453 = vperm.xlu0 %2045, %v1327_v40  }
 0x26d   : > { %1468 = vperm.xlu1 %2046, %v1330_v41   ;;  %1463 = vperm.xlu0 %2045, %v1329_v42  }
 0x271   : > { %1478 = vperm.xlu1 %2046, %v1332_v46   ;;  %1473 = vperm.xlu0 %2045, %v1331_v26   ;;  %v1874_v46 = vld [vmem:[#allocation6 + $0x110] sm:$0xff]  ;;  %v1875_v26 = vld [vmem:[#allocation6 + $0x118] sm:$0xff] }
 0x275   : > { %1488 = vperm.xlu1 %2046, %v1334_v51   ;;  %1483 = vperm.xlu0 %2045, %v1333_v48   ;;  %v1351_v51 = vld [vmem:[#allocation6 + $0x40] sm:$0xff] }
 0x279   : > { %1498 = vperm.xlu1 %2046, %v1336_v49   ;;  %1493 = vperm.xlu0 %2045, %v1335_v52   ;;  %v1352_v52 = vld [vmem:[#allocation6 + $0x48] sm:$0xff] }
 0x27d   : > { %1508 = vperm.xlu1 %2046, %v1338_v54   ;;  %1503 = vperm.xlu0 %2045, %v1337_v56   ;;  %v1872_v54 = vld [vmem:[#allocation6 + $0x100] sm:$0xff]  ;;  %v1873_v56 = vld [vmem:[#allocation6 + $0x108] sm:$0xff] }
 0x2d0   : > { %v1380_v55 = vpop.permute.xlu1 %1379  ;;  %v1370_v58 = vpop.permute.xlu0 %1369 }
 0x2d1   : > { %v1427_v20 = vmul.f32 %v1370_v58, %v1343_v5  ;;  %v1428_v50 = vmul.f32 %v1370_v58, %v1344_v16  ;;  %v1587_v28 = vmul.f32 %v1864_v19, %v1370_v58  ;;  %v1588_v29 = vmul.f32 %v1865_v38, %v1370_v58 }
 0x2d2   : > { %v1431_v8 = vmul.f32 %v1380_v55, %v1347_v21  ;;  %v1432_v40 = vmul.f32 %v1380_v55, %v1348_v43  ;;  %v1591_v41 = vmul.f32 %v1868_v53, %v1380_v55  ;;  %v1592_v42 = vmul.f32 %v1869_v39, %v1380_v55  ;;  %v1357_v21 = vld [vmem:[#allocation6 + $0x70] sm:$0xff] }
 0x2d4   : > { %v1385_v62 = vpop.permute.xlu1 %1384  ;;  %v1375_v33 = vpop.permute.xlu0 %1374 }
 0x2d5   : > { %v1429_v12 = vmul.f32 %v1375_v33, %v1345_v15  ;;  %v1430_v23 = vmul.f32 %v1375_v33, %v1346_v7  ;;  %v1589_v25 = vmul.f32 %v1866_v9, %v1375_v33  ;;  %v1590_v27 = vmul.f32 %v1867_v47, %v1375_v33 }
 0x2d6   : > { %v1433_v18 = vmul.f32 %v1385_v62, %v1349_v22  ;;  %v1434_v17 = vmul.f32 %v1385_v62, %v1350_v32  ;;  %v1593_v24 = vmul.f32 %v1870_v34, %v1385_v62  ;;  %v1594_v31 = vmul.f32 %v1871_v35, %v1385_v62  ;;  %v1358_v22 = vld [vmem:[#allocation6 + $0x78] sm:$0xff]  ;;  %v1356_v32 = vld [vmem:[#allocation6 + $0x68] sm:$0xff]  ;;  %v1876_v34 = vld [vmem:[#allocation6 + $0x120] sm:$0xff] }
 0x2d7   : > { %v1877_v35 = vld [vmem:[#allocation6 + $0x128] sm:$0xff] }
 0x2d8   : > { %v2613_v60 = vpop.permute.xlu1 %1394  ;;  %v2615_v4 = vpop.permute.xlu0 %1389 }
 0x2d9   : > { %v1437_v47 = vmul.f32 %v2613_v60, %v1353_v36  ;;  %v1438_v16 = vmul.f32 %v2613_v60, %v1354_v14  ;;  %v1597_v19 = vmul.f32 %v1874_v46, %v2613_v60  ;;  %v1598_v38 = vmul.f32 %v1875_v26, %v2613_v60  ;;  %v1882_v36 = vld [vmem:[#allocation6 + $0x150] sm:$0xff]  ;;  %v1883_v14 = vld [vmem:[#allocation6 + $0x158] sm:$0xff]  ;;  %v1881_v46 = vld [vmem:[#allocation6 + $0x148] sm:$0xff] }
 0x2dc   : > { %v2617_v63 = vpop.permute.xlu1 %1404  ;;  %v2619_v30 = vpop.permute.xlu0 %1399 }
 0x2e0   : > { %v2621_v1 = vpop.permute.xlu1 %1414  ;;  %v2623_v2 = vpop.permute.xlu0 %1409 }
 0x2e4   : > { %v2625_v10 = vpop.permute.xlu1 %1424  ;;  %v2627_v11 = vpop.permute.xlu0 %1419 }
 0x2e8   : > { %v1459_v44 = vpop.permute.xlu1 %1458  ;;  %v1454_v37 = vpop.permute.xlu0 %1453 }
 0x2e9   : > { %v1513_v45 = vadd.f32 %v1459_v44, %v1429_v12  ;;  %v1514_v59 = vadd.f32 %v1459_v44, %v1430_v23  ;;  %v1613_v57 = vadd.f32 %v1589_v25, %v1459_v44  ;;  %v1614_v61 = vadd.f32 %v1590_v27, %v1459_v44 }
 0x2ea   : > { %v1511_v0 = vadd.f32 %v1454_v37, %v1427_v20  ;;  %v1512_v3 = vadd.f32 %v1454_v37, %v1428_v50  ;;  %v1611_v6 = vadd.f32 %v1587_v28, %v1454_v37  ;;  %v1612_v13 = vadd.f32 %v1588_v29, %v1454_v37  ;;  %v1878_v20 = vld [vmem:[#allocation6 + $0x130] sm:$0xff]  ;;  %v1879_v50 = vld [vmem:[#allocation6 + $0x138] sm:$0xff]  ;;  %v1355_v28 = vld [vmem:[#allocation6 + $0x60] sm:$0xff] }
 0x2eb   : > { %1537 = vst [vmem:[#allocation10 + $0x10] sm:$0xff] %v1513_v45  ;;  %1538 = vst [vmem:[#allocation10 + $0x18] sm:$0xff] %v1514_v59  ;;  %v1435_v12 = vmul.f32 %v2615_v4, %v1351_v51  ;;  %v1436_v23 = vmul.f32 %v2615_v4, %v1352_v52  ;;  %v1595_v25 = vmul.f32 %v1872_v54, %v2615_v4 }
 0x2ec   : > { %1890 = vst [vmem:[#allocation10 + $0xd0] sm:$0xff] %v1613_v57  ;;  %1891 = vst [vmem:[#allocation10 + $0xd8] sm:$0xff] %v1614_v61  ;;  %v1469_v48 = vpop.permute.xlu1 %1468  ;;  %v1464_v49 = vpop.permute.xlu0 %1463  ;;  %v1596_v27 = vmul.f32 %v1873_v56, %v2615_v4  ;;  %v1441_v57 = vmul.f32 %v2617_v63, %v1357_v21  ;;  %v1442_v61 = vmul.f32 %v2617_v63, %v1358_v22  ;;  %v1887_v21 = vld [vmem:[#allocation6 + $0x178] sm:$0xff]  ;;  %v1363_v22 = vld [vmem:[#allocation6 + $0xa0] sm:$0xff] }
 0x2ed   : > { %1535 = vst [vmem:[#allocation10] sm:$0xff] %v1511_v0  ;;  %1536 = vst [vmem:[#allocation10 + $0x8] sm:$0xff] %v1512_v3  ;;  %v1517_v58 = vadd.f32 %v1469_v48, %v1433_v18  ;;  %v1518_v62 = vadd.f32 %v1469_v48, %v1434_v17  ;;  %v1617_v33 = vadd.f32 %v1593_v24, %v1469_v48 }
 0x2ee   : > { %1888 = vst [vmem:[#allocation10 + $0xc0] sm:$0xff] %v1611_v6  ;;  %1889 = vst [vmem:[#allocation10 + $0xc8] sm:$0xff] %v1612_v13  ;;  %v1618_v5 = vadd.f32 %v1594_v31, %v1469_v48  ;;  %v1515_v15 = vadd.f32 %v1464_v49, %v1431_v8  ;;  %v1516_v7 = vadd.f32 %v1464_v49, %v1432_v40  ;;  %v1361_v6 = vld [vmem:[#allocation6 + $0x90] sm:$0xff]  ;;  %v1362_v13 = vld [vmem:[#allocation6 + $0x98] sm:$0xff] }
 0x2ef   : > { %v1615_v9 = vadd.f32 %v1591_v41, %v1464_v49  ;;  %v1616_v55 = vadd.f32 %v1592_v42, %v1464_v49  ;;  %1541 = vst [vmem:[#allocation10 + $0x30] sm:$0xff] %v1517_v58  ;;  %1542 = vst [vmem:[#allocation10 + $0x38] sm:$0xff] %v1518_v62  ;;  %v1601_v0 = vmul.f32 %v1878_v20, %v2617_v63  ;;  %v1359_v8 = vld [vmem:[#allocation6 + $0x80] sm:$0xff]  ;;  %v1360_v41 = vld [vmem:[#allocation6 + $0x88] sm:$0xff] }
 0x2f0   : > { %1894 = vst [vmem:[#allocation10 + $0xf0] sm:$0xff] %v1617_v33  ;;  %1895 = vst [vmem:[#allocation10 + $0xf8] sm:$0xff] %v1618_v5  ;;  %v1479_v60 = vpop.permute.xlu1 %1478  ;;  %v1474_v29 = vpop.permute.xlu0 %1473  ;;  %v1602_v3 = vmul.f32 %v1879_v50, %v2617_v63  ;;  %v1439_v18 = vmul.f32 %v2619_v30, %v1355_v28  ;;  %v1440_v17 = vmul.f32 %v2619_v30, %v1356_v32  ;;  %v1880_v42 = vld [vmem:[#allocation6 + $0x140] sm:$0xff]  ;;  %v1364_v20 = vld [vmem:[#allocation6 + $0xa8] sm:$0xff] }
 0x2f1   : > { %1539 = vst [vmem:[#allocation10 + $0x20] sm:$0xff] %v1515_v15  ;;  %1540 = vst [vmem:[#allocation10 + $0x28] sm:$0xff] %v1516_v7  ;;  %v1521_v44 = vadd.f32 %v1479_v60, %v1437_v47  ;;  %v1522_v37 = vadd.f32 %v1479_v60, %v1438_v16  ;;  %v1621_v43 = vadd.f32 %v1597_v19, %v1479_v60  ;;  %v1365_v15 = vld [vmem:[#allocation6 + $0xb0] sm:$0xff]  ;;  %v1366_v7 = vld [vmem:[#allocation6 + $0xb8] sm:$0xff] }
 0x2f2   : > { %1892 = vst [vmem:[#allocation10 + $0xe0] sm:$0xff] %v1615_v9  ;;  %1893 = vst [vmem:[#allocation10 + $0xe8] sm:$0xff] %v1616_v55  ;;  %v1622_v53 = vadd.f32 %v1598_v38, %v1479_v60  ;;  %v1519_v39 = vadd.f32 %v1474_v29, %v1435_v12  ;;  %v1520_v45 = vadd.f32 %v1474_v29, %v1436_v23  ;;  %v1886_v38 = vld [vmem:[#allocation6 + $0x170] sm:$0xff]  ;;  %v1884_v50 = vld [vmem:[#allocation6 + $0x160] sm:$0xff] }
 0x2f3   : > { %v1619_v59 = vadd.f32 %v1595_v25, %v1474_v29  ;;  %v1620_v4 = vadd.f32 %v1596_v27, %v1474_v29  ;;  %1545 = vst [vmem:[#allocation10 + $0x50] sm:$0xff] %v1521_v44  ;;  %1546 = vst [vmem:[#allocation10 + $0x58] sm:$0xff] %v1522_v37  ;;  %v1599_v24 = vmul.f32 %v1876_v34, %v2619_v30  ;;  %v1885_v28 = vld [vmem:[#allocation6 + $0x168] sm:$0xff] }
 0x2f4   : > { %1898 = vst [vmem:[#allocation10 + $0x110] sm:$0xff] %v1621_v43  ;;  %1899 = vst [vmem:[#allocation10 + $0x118] sm:$0xff] %v1622_v53  ;;  %v1600_v31 = vmul.f32 %v1877_v35, %v2619_v30  ;;  %v1489_v63 = vpop.permute.xlu1 %1488  ;;  %v1484_v40 = vpop.permute.xlu0 %1483  ;;  %v1445_v58 = vmul.f32 %v2621_v1, %v1361_v6  ;;  %v1446_v62 = vmul.f32 %v2621_v1, %v1362_v13 }
 0x2f5   : > { %1543 = vst [vmem:[#allocation10 + $0x40] sm:$0xff] %v1519_v39  ;;  %1544 = vst [vmem:[#allocation10 + $0x48] sm:$0xff] %v1520_v45  ;;  %v1525_v26 = vadd.f32 %v1489_v63, %v1441_v57  ;;  %v1526_v51 = vadd.f32 %v1489_v63, %v1442_v61  ;;  %v1625_v48 = vadd.f32 %v1601_v0, %v1489_v63 }
 0x2f6   : > { %1896 = vst [vmem:[#allocation10 + $0x100] sm:$0xff] %v1619_v59  ;;  %1897 = vst [vmem:[#allocation10 + $0x108] sm:$0xff] %v1620_v4  ;;  %v1626_v49 = vadd.f32 %v1602_v3, %v1489_v63  ;;  %v1523_v52 = vadd.f32 %v1484_v40, %v1439_v18  ;;  %v1524_v54 = vadd.f32 %v1484_v40, %v1440_v17 }
 0x2f7   : > { %v1623_v56 = vadd.f32 %v1599_v24, %v1484_v40  ;;  %v1624_v30 = vadd.f32 %v1600_v31, %v1484_v40  ;;  %v1605_v33 = vmul.f32 %v1882_v36, %v2621_v1  ;;  %v1606_v5 = vmul.f32 %v1883_v14, %v2621_v1  ;;  %1549 = vst [vmem:[#allocation10 + $0x70] sm:$0xff] %v1525_v26 }
 0x2f8   : > { %1550 = vst [vmem:[#allocation10 + $0x78] sm:$0xff] %v1526_v51  ;;  %1902 = vst [vmem:[#allocation10 + $0x130] sm:$0xff] %v1625_v48  ;;  %v1443_v9 = vmul.f32 %v2623_v2, %v1359_v8  ;;  %v1444_v55 = vmul.f32 %v2623_v2, %v1360_v41  ;;  %v1603_v47 = vmul.f32 %v1880_v42, %v2623_v2  ;;  %v1499_v19 = vpop.permute.xlu1 %1498  ;;  %v1494_v1 = vpop.permute.xlu0 %1493 }
 0x2f9   : > { %1903 = vst [vmem:[#allocation10 + $0x138] sm:$0xff] %v1626_v49  ;;  %v1604_v16 = vmul.f32 %v1881_v46, %v2623_v2  ;;  %1547 = vst [vmem:[#allocation10 + $0x60] sm:$0xff] %v1523_v52  ;;  %v1529_v12 = vadd.f32 %v1499_v19, %v1445_v58  ;;  %v1530_v23 = vadd.f32 %v1499_v19, %v1446_v62 }
 0x2fa   : > { %1548 = vst [vmem:[#allocation10 + $0x68] sm:$0xff] %v1524_v54  ;;  %1900 = vst [vmem:[#allocation10 + $0x120] sm:$0xff] %v1623_v56  ;;  %v1629_v25 = vadd.f32 %v1605_v33, %v1499_v19  ;;  %v1630_v27 = vadd.f32 %v1606_v5, %v1499_v19  ;;  %v1527_v60 = vadd.f32 %v1494_v1, %v1443_v9 }
 0x2fb   : > { %1901 = vst [vmem:[#allocation10 + $0x128] sm:$0xff] %v1624_v30  ;;  %v1528_v29 = vadd.f32 %v1494_v1, %v1444_v55  ;;  %v1627_v32 = vadd.f32 %v1603_v47, %v1494_v1  ;;  %v1628_v2 = vadd.f32 %v1604_v16, %v1494_v1  ;;  %1553 = vst [vmem:[#allocation10 + $0x90] sm:$0xff] %v1529_v12 }
 0x2fc   : > { %1554 = vst [vmem:[#allocation10 + $0x98] sm:$0xff] %v1530_v23  ;;  %1906 = vst [vmem:[#allocation10 + $0x150] sm:$0xff] %v1629_v25  ;;  %v1449_v34 = vmul.f32 %v2625_v10, %v1365_v15  ;;  %v1450_v35 = vmul.f32 %v2625_v10, %v1366_v7  ;;  %v1609_v44 = vmul.f32 %v1886_v38, %v2625_v10  ;;  %v1509_v43 = vpop.permute.xlu1 %1508  ;;  %v1504_v4 = vpop.permute.xlu0 %1503 }
 0x2fd   : > { %1907 = vst [vmem:[#allocation10 + $0x158] sm:$0xff] %v1630_v27  ;;  %v1610_v37 = vmul.f32 %v1887_v21, %v2625_v10  ;;  %1551 = vst [vmem:[#allocation10 + $0x80] sm:$0xff] %v1527_v60  ;;  %v1447_v53 = vmul.f32 %v2627_v11, %v1363_v22  ;;  %v1448_v39 = vmul.f32 %v2627_v11, %v1364_v20 }
 0x2fe   : > { %1552 = vst [vmem:[#allocation10 + $0x88] sm:$0xff] %v1528_v29  ;;  %1904 = vst [vmem:[#allocation10 + $0x140] sm:$0xff] %v1627_v32  ;;  %v1607_v45 = vmul.f32 %v1884_v50, %v2627_v11  ;;  %v1608_v59 = vmul.f32 %v1885_v28, %v2627_v11  ;;  %v1533_v57 = vadd.f32 %v1509_v43, %v1449_v34 }
 0x2ff   : > { %1905 = vst [vmem:[#allocation10 + $0x148] sm:$0xff] %v1628_v2  ;;  %v1534_v61 = vadd.f32 %v1509_v43, %v1450_v35  ;;  %v1633_v0 = vadd.f32 %v1609_v44, %v1509_v43  ;;  %v1634_v3 = vadd.f32 %v1610_v37, %v1509_v43  ;;  %v1531_v6 = vadd.f32 %v1504_v4, %v1447_v53 }
 0x300   : > { %v1532_v10 = vadd.f32 %v1504_v4, %v1448_v39  ;;  %v1631_v13 = vadd.f32 %v1607_v45, %v1504_v4  ;;  %v1632_v18 = vadd.f32 %v1608_v59, %v1504_v4  ;;  %1557 = vst [vmem:[#allocation10 + $0xb0] sm:$0xff] %v1533_v57 }
 0x301   : > { %1558 = vst [vmem:[#allocation10 + $0xb8] sm:$0xff] %v1534_v61  ;;  %1910 = vst [vmem:[#allocation10 + $0x170] sm:$0xff] %v1633_v0 }
 0x302   : > { %1911 = vst [vmem:[#allocation10 + $0x178] sm:$0xff] %v1634_v3  ;;  %1555 = vst [vmem:[#allocation10 + $0xa0] sm:$0xff] %v1531_v6 }
 0x303   : > { %1556 = vst [vmem:[#allocation10 + $0xa8] sm:$0xff] %v1532_v10  ;;  %1908 = vst [vmem:[#allocation10 + $0x160] sm:$0xff] %v1631_v13 }
 0x304   : > { %1909 = vst [vmem:[#allocation10 + $0x168] sm:$0xff] %v1632_v18 }
 0x305 PF: > { %p2663_p11 = scmp.eq.s32.totalorder %s1781_s18, 1  ;;  %s2139_s29 = smov [#allocation10]  }
 0x306   : > { %s1679_s30 = sshll.u32 %s2139_s29, 4  ;;  %s1680_s30 = int_to_ptr.vmem [resolvable:$true] %s1679_s30 }
 0x307   : > { %s2075_s5 = scalar_lea.vmem %s1680_s30, 6144  ;;  %s2081_s6 = scalar_lea.vmem %s1680_s30, 12288 }
 0x308   : > { %p2076_p12 = scmp.ne.s32.totalorder %s1680_s30, %s2075_s5  ;;  %p2082_p2 = scmp.lt.s32.totalorder %s1680_s30, %s1680_s30 }
 0x309   : > { %p2083_p3 = scmp.lt.s32.totalorder %s2081_s6, %s2075_s5 }
 0x30a   : > { %p2077_p13 = pnand %p2076_p12, %p2663_p11 }
 0x30b   : > { %p2084_p6 = por %p2083_p3, %p2082_p2 }
 0x30c   : > { %p2078_p1 = pneg %p2077_p13 }
 0x30e   : > { %p2085_p8 = pnand %p2084_p6, %p2078_p1 }
 0x310   : > { %2088 = shalt.err (!%p2085_p8)
}
 0x311   : > { %s2089_s8 = scalar_lea.hbm %s2702_s4, 6144 }
 0x312   : > { %p2090_p7 = scmp.ne.s32.totalorder %s2702_s4, %s2089_s8  ;;  %p2095_p4 = scmp.lt.u32.totalorder %s2089_s8, %s2702_s4 }
 0x314   : > { %p2091_p9 = pnand %p2090_p7, %p2663_p11 }
 0x316   : > { %p2092_p0 = pneg %p2091_p9 }
 0x318   : > { %p2097_p5 = pnand %p2095_p4, %p2092_p0 }
 0x31a   : > { %2100 = shalt.err (!%p2097_p5)
}
 0x31b   : > { %s2140_s13 = smov 256   ;;  %s2141_s14 = smov 16  }
 0x31c   : > { %1971 = dma.vmem_to_hbm [thread:$0]  (%p2663_p11), %s1680_s30, 6144, %s2702_s4, [#allocation9], %s2140_s13, %s2140_s13, %s2141_s14  }
 0x31d PF: > { %p1987_p10 = scmp.eq.s32.totalorder %s1782_s19, 1  ;;  %p2706_p12 = scmp.ge.s32.totalorder %s2131_s17, 2 }
 0x31f   : > { %p1979_p13 = pnand %p1987_p10, %p2706_p12 }
 0x321   : > { %2118 = dma.done.wait (!%p1979_p13), [#allocation9], 6144  }
 0x322   : > { %2120 = vsyncadd (!%p1979_p13), [#allocation9], 4294961152  ;;  %s20_s17 = sadd.s32 1, %s2131_s17   ;;  %s2707_s15 = smov %s2127_s16 }
 0x323   : > { %p17_p1 = scmp.ge.s32.totalorder %s20_s17, 4   ;;  %s2708_s16 = smov %s2710_s20 }
 0x325   :  { %19 = sbr.rel (!%p17_p1) target bundleno = 5 (0x5), region = 103 }
 0x32c   :  { %1700 = vsyncpa [#allocation8], 1 }
 0x32d   :  { %1702 = vsyncpa [#allocation8 + $0x1], 1 }
 0x32e   :  { %1703 = vsyncpa [#allocation9], 1 }
 0x32f   :  { %1705 = vsyncpa [#allocation9 + $0x1], 1 }

</bundles_post_ra>
